<compile_context>
chip_gen: v5e
topology: v5e:2x2
jax: 0.10.0
libtpu: 0.0.40
codegen_flags: <defaults>
</compile_context>

<pallas_src>
import jax
import jax.numpy as jnp
from jax.experimental import pallas as pl
from jax.experimental.pallas import tpu as pltpu


def bottleneck_kernel(x_ref, w1_ref, b1_ref, w2_ref, b2_ref, w3_ref, b3_ref,
                      o_ref, pad_ref):
    # x_ref block: (1, H, W, Cin)
    H, W, Cin = x_ref.shape[1], x_ref.shape[2], x_ref.shape[3]
    width = w1_ref.shape[1]
    Cout = w3_ref.shape[1]

    x = x_ref[0].reshape(H * W, Cin).astype(jnp.float32)        # (H*W, Cin)

    # ---- conv1 (1x1, BN scale pre-folded into w1) + bias + ReLU --------------
    h1 = jnp.dot(x, w1_ref[...], preferred_element_type=jnp.float32)
    h1 = jnp.maximum(h1 + b1_ref[...], 0.0)

    # ---- conv2 (3x3, stride=1, padding=1) as ONE im2col matmul ---------------
    # Refresh only the 1-pixel zero border of the padded scratch; the interior
    # is fully overwritten below.  No program_id==0 guard (see header: scratch
    # is per-core under the "parallel" batch axis).
    zrow = jnp.zeros((1, W + 2, width), jnp.float32)
    zcol = jnp.zeros((H, 1, width), jnp.float32)
    pad_ref[0:1, :, :] = zrow
    pad_ref[H + 1:H + 2, :, :] = zrow
    pad_ref[1:H + 1, 0:1, :] = zcol
    pad_ref[1:H + 1, W + 1:W + 2, :] = zcol
    pad_ref[1:H + 1, 1:W + 1, :] = h1.reshape(H, W, width)

    # 9 shifted patches concatenated along channels -> (H*W, 9*width), then a
    # single K = 9*width matmul against the (9*width, width) folded weights.
    patches = [pad_ref[dy:dy + H, dx:dx + W, :].reshape(H * W, width)
               for dy in range(3) for dx in range(3)]
    im2col = jnp.concatenate(patches, axis=-1)                   # (H*W, 9*width)
    h2 = jnp.dot(im2col, w2_ref[...], preferred_element_type=jnp.float32)
    h2 = jnp.maximum(h2 + b2_ref[...], 0.0)

    # ---- conv3 (1x1) + bias + residual add + ReLU ----------------------------
    h3 = jnp.dot(h2, w3_ref[...], preferred_element_type=jnp.float32)
    out = jnp.maximum(h3 + b3_ref[...] + x, 0.0)   # identity path (downsample=None)

    o_ref[0] = out.reshape(H, W, Cout).astype(o_ref.dtype)


def _full_spec(arr):
    nd = arr.ndim
    return pl.BlockSpec(arr.shape, lambda n, _nd=nd: (0,) * _nd)


def bottleneck_forward(x_nchw, params):
    w1, s1, b1, w2, s2, b2, w3, s3, b3 = params
    N, Cin, H, W = x_nchw.shape
    width = w1.shape[1]
    Cout = w3.shape[1]

    # Fold the (eval-mode) BN scales into the conv weights outside the kernel;
    # only the per-channel shifts remain as in-kernel bias adds.
    w1f = (w1 * s1).astype(jnp.float32)                              # (Cin, width)
    w2f = (w2 * s2).reshape(9 * width, width).astype(jnp.float32)    # (9*width, width)
    w3f = (w3 * s3).astype(jnp.float32)                              # (width, Cout)

    x = jnp.transpose(x_nchw, (0, 2, 3, 1))  # NCHW -> NHWC

    out_nhwc = pl.pallas_call(
        bottleneck_kernel,
        out_shape=jax.ShapeDtypeStruct((N, H, W, Cout), x.dtype),
        grid_spec=pltpu.PrefetchScalarGridSpec(
            num_scalar_prefetch=0,
            grid=(N,),
            in_specs=[
                pl.BlockSpec((1, H, W, Cin), lambda n: (n, 0, 0, 0)),
                _full_spec(w1f), _full_spec(b1),
                _full_spec(w2f), _full_spec(b2),
                _full_spec(w3f), _full_spec(b3),
            ],
            out_specs=pl.BlockSpec((1, H, W, Cout), lambda n: (n, 0, 0, 0)),
            scratch_shapes=[pltpu.VMEM((H + 2, W + 2, width), jnp.float32)],
        ),
        compiler_params=pltpu.CompilerParams(
            dimension_semantics=("parallel",)),
    )(x, w1f, b1, w2f, b2, w3f, b3)

    return jnp.transpose(out_nhwc, (0, 3, 1, 2))  # NHWC -> NCHW


def reference(x_nchw, params):
    """Pure-JAX reference of the same (eval-mode-BN) forward pass."""
    w1, s1, b1, w2, s2, b2, w3, s3, b3 = params
    x = jnp.transpose(x_nchw, (0, 2, 3, 1))
    H, W = x.shape[1], x.shape[2]
    h1 = jnp.maximum(jnp.einsum('nhwc,cd->nhwd', x, w1) * s1 + b1, 0.0)
    h1p = jnp.pad(h1, ((0, 0), (1, 1), (1, 1), (0, 0)))
    acc = 0.0
    for dy in range(3):
        for dx in range(3):
            acc = acc + jnp.einsum('nhwc,cd->nhwd',
                                   h1p[:, dy:dy + H, dx:dx + W, :], w2[dy, dx])
    h2 = jnp.maximum(acc * s2 + b2, 0.0)
    h3 = jnp.einsum('nhwc,cd->nhwd', h2, w3) * s3 + b3
    out = jnp.maximum(h3 + x, 0.0)
    return jnp.transpose(out, (0, 3, 1, 2))


if __name__ == "__main__":
    key = jax.random.PRNGKey(0)
    N, inplanes, H, W = 2, 32, 16, 16
    planes = 8
    groups, base_width, stride = 1, 64, 1
    width = int(planes * (base_width / 64.0)) * groups          # = 8
    cout = planes * 4                                           # expansion = 4
    assert cout == inplanes and stride == 1                     # downsample is None

    ks = jax.random.split(key, 16)

    # Conv weights, initialized in PyTorch layout (out, in, kh, kw), then
    # repacked for the kernel.
    w1_t = 0.1 * jax.random.normal(ks[0], (width, inplanes, 1, 1), jnp.float32)
    w2_t = 0.1 * jax.random.normal(ks[1], (width, width, 3, 3), jnp.float32)
    w3_t = 0.1 * jax.random.normal(ks[2], (cout, width, 1, 1), jnp.float32)
    w1 = jnp.transpose(w1_t[:, :, 0, 0], (1, 0))      # (Cin, width)
    w2 = jnp.transpose(w2_t, (2, 3, 1, 0))            # (3, 3, Cin, Cout)
    w3 = jnp.transpose(w3_t[:, :, 0, 0], (1, 0))      # (width, Cout)

    def bn_fold(kg, kb, km, kv, c):
        gamma = 1.0 + 0.1 * jax.random.normal(kg, (c,), jnp.float32)
        beta = 0.1 * jax.random.normal(kb, (c,), jnp.float32)
        mean = 0.1 * jax.random.normal(km, (c,), jnp.float32)
        var = jnp.abs(jax.random.normal(kv, (c,), jnp.float32)) + 0.5
        eps = 1e-5
        scale = gamma / jnp.sqrt(var + eps)
        shift = beta - mean * scale
        return scale.reshape(1, c), shift.reshape(1, c)

    s1, b1 = bn_fold(ks[3], ks[4], ks[5], ks[6], width)
    s2, b2 = bn_fold(ks[7], ks[8], ks[9], ks[10], width)
    s3, b3 = bn_fold(ks[11], ks[12], ks[13], ks[14], cout)

    x = jax.random.normal(ks[15], (N, inplanes, H, W), jnp.float32)
    params = (w1, s1, b1, w2, s2, b2, w3, s3, b3)

    out = jax.block_until_ready(bottleneck_forward(x, params))
    ref = reference(x, params)

    assert out.shape == (N, cout, H, W)
    assert jnp.allclose(out, ref, atol=1e-4, rtol=1e-4), float(jnp.abs(out - ref).max())
    print("KERNEL_OK")
</pallas_src>

<mosaic_0001>
module attributes {stable_mosaic.version = 11 : i64} {
  func.func @bottleneck_kernel(%arg0: i32, %arg1: memref<1x16x16x32xf32, #tpu.memory_space<vmem>>, %arg2: memref<32x8xf32, #tpu.memory_space<vmem>>, %arg3: memref<1x8xf32, #tpu.memory_space<vmem>>, %arg4: memref<72x8xf32, #tpu.memory_space<vmem>>, %arg5: memref<1x8xf32, #tpu.memory_space<vmem>>, %arg6: memref<8x32xf32, #tpu.memory_space<vmem>>, %arg7: memref<1x32xf32, #tpu.memory_space<vmem>>, %arg8: memref<1x16x16x32xf32, #tpu.memory_space<vmem>>, %arg9: memref<18x18x8xf32, #tpu.memory_space<vmem>>) attributes {dimension_semantics = [#tpu.dimension_semantics<parallel>], iteration_bounds = array<i64: 2>, scalar_prefetch = 0 : i64, scratch_operands = 1 : i64, tpu.core_type = #tpu.core_type<tc>, window_params = [{transform_indices = @transform_0, window_bounds = array<i64: 1, 16, 16, 32>}, {pipeline_mode = #tpu.pipeline_mode<synchronous>, transform_indices = @transform_1, window_bounds = array<i64: 32, 8>}, {pipeline_mode = #tpu.pipeline_mode<synchronous>, transform_indices = @transform_2, window_bounds = array<i64: 1, 8>}, {pipeline_mode = #tpu.pipeline_mode<synchronous>, transform_indices = @transform_3, window_bounds = array<i64: 72, 8>}, {pipeline_mode = #tpu.pipeline_mode<synchronous>, transform_indices = @transform_4, window_bounds = array<i64: 1, 8>}, {pipeline_mode = #tpu.pipeline_mode<synchronous>, transform_indices = @transform_5, window_bounds = array<i64: 8, 32>}, {pipeline_mode = #tpu.pipeline_mode<synchronous>, transform_indices = @transform_6, window_bounds = array<i64: 1, 32>}, {transform_indices = @transform_7, window_bounds = array<i64: 1, 16, 16, 32>}]} {
    %c0 = arith.constant 0 : index
    %c0_0 = arith.constant 0 : index
    %c0_1 = arith.constant 0 : index
    %c0_2 = arith.constant 0 : index
    %0 = vector.load %arg1[%c0, %c0_0, %c0_1, %c0_2] : memref<1x16x16x32xf32, #tpu.memory_space<vmem>>, vector<1x16x16x32xf32>
    %1 = vector.shape_cast %0 : vector<1x16x16x32xf32> to vector<16x16x32xf32>
    %2 = vector.shape_cast %1 : vector<16x16x32xf32> to vector<256x32xf32>
    %c0_3 = arith.constant 0 : index
    %c0_4 = arith.constant 0 : index
    %3 = vector.load %arg2[%c0_3, %c0_4] : memref<32x8xf32, #tpu.memory_space<vmem>>, vector<32x8xf32>
    %cst = arith.constant dense<0.000000e+00> : vector<256x8xf32>
    %4 = tpu.matmul %2, %3, %cst {dimension_numbers = #tpu.dot_dimension_numbers<[1], [0], [0], [1], [0, 0, 1, 1], [], []>} : vector<256x32xf32>, vector<32x8xf32>, vector<256x8xf32> -> vector<256x8xf32>
    %c0_5 = arith.constant 0 : index
    %c0_6 = arith.constant 0 : index
    %5 = vector.load %arg3[%c0_5, %c0_6] : memref<1x8xf32, #tpu.memory_space<vmem>>, vector<1x8xf32>
    %6 = vector.broadcast %5 : vector<1x8xf32> to vector<256x8xf32>
    %7 = arith.addf %4, %6 : vector<256x8xf32>
    %cst_7 = arith.constant 0.000000e+00 : f32
    %8 = vector.broadcast %cst_7 : f32 to vector<256x8xf32>
    %9 = arith.maximumf %7, %8 : vector<256x8xf32>
    %cst_8 = arith.constant 0.000000e+00 : f32
    %10 = vector.broadcast %cst_8 : f32 to vector<1x18x8xf32>
    %cst_9 = arith.constant 0.000000e+00 : f32
    %11 = vector.broadcast %cst_9 : f32 to vector<16x1x8xf32>
    %c0_10 = arith.constant 0 : index
    %c0_11 = arith.constant 0 : index
    %c0_12 = arith.constant 0 : index
    %12 = vector.load %arg9[%c0_10, %c0_11, %c0_12] : memref<18x18x8xf32, #tpu.memory_space<vmem>>, vector<1x18x8xf32>
    tpu.vector_store %arg9[%c0_10, %c0_11, %c0_12], %10 {strides = array<i32>} : memref<18x18x8xf32, #tpu.memory_space<vmem>>, vector<1x18x8xf32>,
    %c17 = arith.constant 17 : index
    %c0_13 = arith.constant 0 : index
    %c0_14 = arith.constant 0 : index
    %13 = vector.load %arg9[%c17, %c0_13, %c0_14] : memref<18x18x8xf32, #tpu.memory_space<vmem>>, vector<1x18x8xf32>
    tpu.vector_store %arg9[%c17, %c0_13, %c0_14], %10 {strides = array<i32>} : memref<18x18x8xf32, #tpu.memory_space<vmem>>, vector<1x18x8xf32>,
    %c1 = arith.constant 1 : index
    %c0_15 = arith.constant 0 : index
    %c0_16 = arith.constant 0 : index
    %14 = vector.load %arg9[%c1, %c0_15, %c0_16] : memref<18x18x8xf32, #tpu.memory_space<vmem>>, vector<16x1x8xf32>
    tpu.vector_store %arg9[%c1, %c0_15, %c0_16], %11 {strides = array<i32>} : memref<18x18x8xf32, #tpu.memory_space<vmem>>, vector<16x1x8xf32>,
    %c1_17 = arith.constant 1 : index
    %c17_18 = arith.constant 17 : index
    %c0_19 = arith.constant 0 : index
    %15 = vector.load %arg9[%c1_17, %c17_18, %c0_19] : memref<18x18x8xf32, #tpu.memory_space<vmem>>, vector<16x1x8xf32>
    tpu.vector_store %arg9[%c1_17, %c17_18, %c0_19], %11 {strides = array<i32>} : memref<18x18x8xf32, #tpu.memory_space<vmem>>, vector<16x1x8xf32>,
    %16 = vector.shape_cast %9 : vector<256x8xf32> to vector<16x16x8xf32>
    %c1_20 = arith.constant 1 : index
    %c1_21 = arith.constant 1 : index
    %c0_22 = arith.constant 0 : index
    %17 = vector.load %arg9[%c1_20, %c1_21, %c0_22] : memref<18x18x8xf32, #tpu.memory_space<vmem>>, vector<16x16x8xf32>
    tpu.vector_store %arg9[%c1_20, %c1_21, %c0_22], %16 {strides = array<i32>} : memref<18x18x8xf32, #tpu.memory_space<vmem>>, vector<16x16x8xf32>,
    %c0_23 = arith.constant 0 : index
    %c0_24 = arith.constant 0 : index
    %c0_25 = arith.constant 0 : index
    %18 = vector.load %arg9[%c0_23, %c0_24, %c0_25] : memref<18x18x8xf32, #tpu.memory_space<vmem>>, vector<16x16x8xf32>
    %19 = vector.shape_cast %18 : vector<16x16x8xf32> to vector<256x8xf32>
    %c0_26 = arith.constant 0 : index
    %c1_27 = arith.constant 1 : index
    %c0_28 = arith.constant 0 : index
    %20 = vector.load %arg9[%c0_26, %c1_27, %c0_28] : memref<18x18x8xf32, #tpu.memory_space<vmem>>, vector<16x16x8xf32>
    %21 = vector.shape_cast %20 : vector<16x16x8xf32> to vector<256x8xf32>
    %c0_29 = arith.constant 0 : index
    %c2 = arith.constant 2 : index
    %c0_30 = arith.constant 0 : index
    %22 = vector.load %arg9[%c0_29, %c2, %c0_30] : memref<18x18x8xf32, #tpu.memory_space<vmem>>, vector<16x16x8xf32>
    %23 = vector.shape_cast %22 : vector<16x16x8xf32> to vector<256x8xf32>
    %c1_31 = arith.constant 1 : index
    %c0_32 = arith.constant 0 : index
    %c0_33 = arith.constant 0 : index
    %24 = vector.load %arg9[%c1_31, %c0_32, %c0_33] : memref<18x18x8xf32, #tpu.memory_space<vmem>>, vector<16x16x8xf32>
    %25 = vector.shape_cast %24 : vector<16x16x8xf32> to vector<256x8xf32>
    %c1_34 = arith.constant 1 : index
    %c1_35 = arith.constant 1 : index
    %c0_36 = arith.constant 0 : index
    %26 = vector.load %arg9[%c1_34, %c1_35, %c0_36] : memref<18x18x8xf32, #tpu.memory_space<vmem>>, vector<16x16x8xf32>
    %27 = vector.shape_cast %26 : vector<16x16x8xf32> to vector<256x8xf32>
    %c1_37 = arith.constant 1 : index
    %c2_38 = arith.constant 2 : index
    %c0_39 = arith.constant 0 : index
    %28 = vector.load %arg9[%c1_37, %c2_38, %c0_39] : memref<18x18x8xf32, #tpu.memory_space<vmem>>, vector<16x16x8xf32>
    %29 = vector.shape_cast %28 : vector<16x16x8xf32> to vector<256x8xf32>
    %c2_40 = arith.constant 2 : index
    %c0_41 = arith.constant 0 : index
    %c0_42 = arith.constant 0 : index
    %30 = vector.load %arg9[%c2_40, %c0_41, %c0_42] : memref<18x18x8xf32, #tpu.memory_space<vmem>>, vector<16x16x8xf32>
    %31 = vector.shape_cast %30 : vector<16x16x8xf32> to vector<256x8xf32>
    %c2_43 = arith.constant 2 : index
    %c1_44 = arith.constant 1 : index
    %c0_45 = arith.constant 0 : index
    %32 = vector.load %arg9[%c2_43, %c1_44, %c0_45] : memref<18x18x8xf32, #tpu.memory_space<vmem>>, vector<16x16x8xf32>
    %33 = vector.shape_cast %32 : vector<16x16x8xf32> to vector<256x8xf32>
    %c2_46 = arith.constant 2 : index
    %c2_47 = arith.constant 2 : index
    %c0_48 = arith.constant 0 : index
    %34 = vector.load %arg9[%c2_46, %c2_47, %c0_48] : memref<18x18x8xf32, #tpu.memory_space<vmem>>, vector<16x16x8xf32>
    %35 = vector.shape_cast %34 : vector<16x16x8xf32> to vector<256x8xf32>
    %36 = tpu.concatenate %19, %21, %23, %25, %27, %29, %31, %33, %35 in 1 : vector<256x8xf32>, vector<256x8xf32>, vector<256x8xf32>, vector<256x8xf32>, vector<256x8xf32>, vector<256x8xf32>, vector<256x8xf32>, vector<256x8xf32>, vector<256x8xf32> -> vector<256x72xf32>
    %c0_49 = arith.constant 0 : index
    %c0_50 = arith.constant 0 : index
    %37 = vector.load %arg4[%c0_49, %c0_50] : memref<72x8xf32, #tpu.memory_space<vmem>>, vector<72x8xf32>
    %cst_51 = arith.constant dense<0.000000e+00> : vector<256x8xf32>
    %38 = tpu.matmul %36, %37, %cst_51 {dimension_numbers = #tpu.dot_dimension_numbers<[1], [0], [0], [1], [0, 0, 1, 1], [], []>} : vector<256x72xf32>, vector<72x8xf32>, vector<256x8xf32> -> vector<256x8xf32>
    %c0_52 = arith.constant 0 : index
    %c0_53 = arith.constant 0 : index
    %39 = vector.load %arg5[%c0_52, %c0_53] : memref<1x8xf32, #tpu.memory_space<vmem>>, vector<1x8xf32>
    %40 = vector.broadcast %39 : vector<1x8xf32> to vector<256x8xf32>
    %41 = arith.addf %38, %40 : vector<256x8xf32>
    %cst_54 = arith.constant 0.000000e+00 : f32
    %42 = vector.broadcast %cst_54 : f32 to vector<256x8xf32>
    %43 = arith.maximumf %41, %42 : vector<256x8xf32>
    %c0_55 = arith.constant 0 : index
    %c0_56 = arith.constant 0 : index
    %44 = vector.load %arg6[%c0_55, %c0_56] : memref<8x32xf32, #tpu.memory_space<vmem>>, vector<8x32xf32>
    %cst_57 = arith.constant dense<0.000000e+00> : vector<256x32xf32>
    %45 = tpu.matmul %43, %44, %cst_57 {dimension_numbers = #tpu.dot_dimension_numbers<[1], [0], [0], [1], [0, 0, 1, 1], [], []>} : vector<256x8xf32>, vector<8x32xf32>, vector<256x32xf32> -> vector<256x32xf32>
    %c0_58 = arith.constant 0 : index
    %c0_59 = arith.constant 0 : index
    %46 = vector.load %arg7[%c0_58, %c0_59] : memref<1x32xf32, #tpu.memory_space<vmem>>, vector<1x32xf32>
    %47 = vector.broadcast %46 : vector<1x32xf32> to vector<256x32xf32>
    %48 = arith.addf %45, %47 : vector<256x32xf32>
    %49 = arith.addf %48, %2 : vector<256x32xf32>
    %cst_60 = arith.constant 0.000000e+00 : f32
    %50 = vector.broadcast %cst_60 : f32 to vector<256x32xf32>
    %51 = arith.maximumf %49, %50 : vector<256x32xf32>
    %52 = vector.shape_cast %51 : vector<256x32xf32> to vector<16x16x32xf32>
    %c0_61 = arith.constant 0 : index
    %c0_62 = arith.constant 0 : index
    %c0_63 = arith.constant 0 : index
    %c0_64 = arith.constant 0 : index
    %53 = vector.load %arg8[%c0_61, %c0_62, %c0_63, %c0_64] : memref<1x16x16x32xf32, #tpu.memory_space<vmem>>, vector<1x16x16x32xf32>
    %54 = vector.shape_cast %53 : vector<1x16x16x32xf32> to vector<16x16x32xf32>
    %55 = vector.shape_cast %52 : vector<16x16x32xf32> to vector<1x16x16x32xf32>
    tpu.vector_store %arg8[%c0_61, %c0_62, %c0_63, %c0_64], %55 {strides = array<i32>} : memref<1x16x16x32xf32, #tpu.memory_space<vmem>>, vector<1x16x16x32xf32>,
    return
  }
  func.func @transform_0(%arg0: i32) -> (i32, i32, i32, i32) {
    %c0_i32 = arith.constant 0 : i32
    %c0_i32_0 = arith.constant 0 : i32
    %c0_i32_1 = arith.constant 0 : i32
    %c0_i32_2 = arith.constant 0 : i32
    return %arg0, %c0_i32, %c0_i32_0, %c0_i32_1 : i32, i32, i32, i32
  }
  func.func @transform_1(%arg0: i32) -> (i32, i32) {
    %c0_i32 = arith.constant 0 : i32
    %c0_i32_0 = arith.constant 0 : i32
    %c0_i32_1 = arith.constant 0 : i32
    return %c0_i32, %c0_i32_0 : i32, i32
  }
  func.func @transform_2(%arg0: i32) -> (i32, i32) {
    %c0_i32 = arith.constant 0 : i32
    %c0_i32_0 = arith.constant 0 : i32
    %c0_i32_1 = arith.constant 0 : i32
    return %c0_i32, %c0_i32_0 : i32, i32
  }
  func.func @transform_3(%arg0: i32) -> (i32, i32) {
    %c0_i32 = arith.constant 0 : i32
    %c0_i32_0 = arith.constant 0 : i32
    %c0_i32_1 = arith.constant 0 : i32
    return %c0_i32, %c0_i32_0 : i32, i32
  }
  func.func @transform_4(%arg0: i32) -> (i32, i32) {
    %c0_i32 = arith.constant 0 : i32
    %c0_i32_0 = arith.constant 0 : i32
    %c0_i32_1 = arith.constant 0 : i32
    return %c0_i32, %c0_i32_0 : i32, i32
  }
  func.func @transform_5(%arg0: i32) -> (i32, i32) {
    %c0_i32 = arith.constant 0 : i32
    %c0_i32_0 = arith.constant 0 : i32
    %c0_i32_1 = arith.constant 0 : i32
    return %c0_i32, %c0_i32_0 : i32, i32
  }
  func.func @transform_6(%arg0: i32) -> (i32, i32) {
    %c0_i32 = arith.constant 0 : i32
    %c0_i32_0 = arith.constant 0 : i32
    %c0_i32_1 = arith.constant 0 : i32
    return %c0_i32, %c0_i32_0 : i32, i32
  }
  func.func @transform_7(%arg0: i32) -> (i32, i32, i32, i32) {
    %c0_i32 = arith.constant 0 : i32
    %c0_i32_0 = arith.constant 0 : i32
    %c0_i32_1 = arith.constant 0 : i32
    %c0_i32_2 = arith.constant 0 : i32
    return %arg0, %c0_i32, %c0_i32_0, %c0_i32_1 : i32, i32, i32, i32
  }
}

</mosaic_0001>

<bundles_post_ra>
// kernel: tpu_custom_call.1
= control target key start
LH: loop header
LB: loop body
LE: loop exit
PB: predicated region body
PF: predicated region fallthrough
CT: control target
= control target key end

     0   :  { %12 = vsyncpa [#allocation4], 0  ;;  %s5049_s0 = inlined_call_operand.hbm [shape: f32[2,16,16,32], index: 0, kind: input, shape index: {}]   ;;  %s5050_s1 = inlined_call_operand.vmem [shape: f32[32,8], index: 1, kind: input, shape index: {}]   ;;  %s5051_s2 = inlined_call_operand.vmem [shape: f32[1,8], index: 2, kind: input, shape index: {}]   ;;  %s5052_s3 = inlined_call_operand.vmem [shape: f32[72,8], index: 3, kind: input, shape index: {}]   ;;  %s5053_s4 = inlined_call_operand.vmem [shape: f32[1,8], index: 4, kind: input, shape index: {}]   ;;  %s5054_s5 = inlined_call_operand.vmem [shape: f32[8,32], index: 5, kind: input, shape index: {}]   ;;  %s5055_s6 = inlined_call_operand.vmem [shape: f32[1,32], index: 6, kind: input, shape index: {}]   ;;  %s5056_s7 = inlined_call_operand.hbm [shape: f32[2,16,16,32], index: 7, kind: output, shape index: {}]  }
   0x1   :  { %14 = vsyncpa [#allocation4 + $0x1], 0 }
   0x2   :  { %15 = vsyncpa [#allocation5], 0 }
   0x3   :  { %17 = vsyncpa [#allocation5 + $0x1], 0  ;;  %s3261_s24 = smov 0   ;;  %s3263_s25 = smov 0  }
   0x4   :  { %s3265_s26 = smov 0   ;;  %s3267_s27 = smov 0  }
   0x5 LB: > { %s3282_s28 = sadd.s32 4294967295, %s3207_s27   ;;  %s2885_s29 = sadd.s32 4294967294, %s3207_s27   ;;  %s3207_s27 = sphi %s3267_s27, %s5158_s27   ;;  %s3203_s26 = sphi %s3265_s26, %s5157_s26   ;;  %s3199_s25 = sphi %s3263_s25, %s5156_s25   ;;  %s3195_s24 = sphi %s3261_s24, %s5155_s24  }
   0x6   : > { %s3286_s30 = sadd.s32 1, %s3207_s27   ;;  %s30_s8 = sadd.s32 1, %s3203_s26 }
   0x7   : > { %s27_s9 = ssub.s32 %s3207_s27, %s3286_s30  ;;  %p37_p0 = scmp.ne.s32.totalorder %s3203_s26, %s3199_s25 }
   0x8   : > { %p28_p1 = scmp.eq.s32.totalorder %s27_s9, 0  ;;  %p38_p2 = scmp.eq.s32.totalorder %s3207_s27, 0 }
   0x9   : > { %p43_p3 = scmp.ne.s32.totalorder %s3199_s25, %s3195_s24  ;;  %p44_p4 = scmp.eq.s32.totalorder %s3282_s28, 0 }
   0xa   : > { %s3298_s10 = scalar_select %p28_p1, %s3203_s26, %s30_s8  }
   0xb   : > { %p3300_p5 = por %p38_p2, %p37_p0  ;;  %p3304_p6 = por %p44_p4, %p43_p3 }
   0xc   : > { %5075 = sst [smem:[#allocation9_spill]] %s3298_s10  ;;  %p193_p7 = scmp.eq.s32.totalorder %s3282_s28, 1 }
   0xd   : > { %p199_p8 = scmp.eq.s32.totalorder %s2885_s29, 1  ;;  %p3023_p10 = scmp.lt.s32.totalorder %s3207_s27, 2 }
   0xe   : > { %p3311_p11 = por %p193_p7, %p37_p0  ;;  %s237_s15 = sand.u32 1, %s3203_s26  }
   0xf   : > { %p3315_p12 = por %p199_p8, %p43_p3  ;;  %s2995_s16 = sshll.u32 %s3207_s27, 8 }
  0x10   : > { %s2888_s17 = sshll.u32 %s237_s15, 8  ;;  %s246_s20 = scalar_lea.hbm %s5049_s0, %s2995_s16 }
  0x11   : > { %s247_s21 = sshll.u32 %s246_s20, 4  ;;  %s241_s22 = scalar_lea.vmem [#allocation3], %s2888_s17  ;;  %s248_s21 = int_to_ptr.hbm [resolvable:$true] %s247_s21 }
  0x12   : > { %s249_s23 = sshll.u32 %s241_s22, 4  ;;  %p3326_p13 = pnand %p3023_p10, %p3300_p5  ;;  %s250_s23 = int_to_ptr.vmem [resolvable:$true] %s249_s23 }
  0x13   : > { %p2891_p0 = scmp.ge.s32.totalorder %s3207_s27, 1  ;;  %p257_p1 = scmp.lt.s32.totalorder %s3207_s27, 3 }
  0x14   : > { %s238_s8 = scalar_lea.sflag [#allocation4], %s237_s15  ;;  %s3111_s9 = sshra.s32 %s248_s21, 4  ;;  %s3112_s9 = int_to_ptr.hbm [resolvable:$true] %s3111_s9 }
  0x15   : > { %s3113_s10 = scalar_lea.hbm %s3112_s9, 256  ;;  %p3115_p3 = pneg %p3326_p13 }
  0x16   : > { %p3114_p2 = scmp.ne.s32.totalorder %s3112_s9, %s3113_s10  ;;  %s3118_s11 = scalar_lea.hbm %s5049_s0, 512 }
  0x17   : > { %p3119_p5 = scmp.lt.s32.totalorder %s3112_s9, %s5049_s0  ;;  %p3120_p8 = scmp.lt.s32.totalorder %s3118_s11, %s3113_s10 }
  0x18   : > { %p3116_p4 = pnand %p3115_p3, %p3114_p2 }
  0x19   : > { %p3121_p10 = por %p3120_p8, %p3119_p5 }
  0x1a   : > { %p3117_p7 = pneg %p3116_p4 }
  0x1c   : > { %p3122_p9 = pnand %p3121_p10, %p3117_p7 }
  0x1e   : > { %3125 = shalt.err (!%p3122_p9)
}
  0x1f   : > { %s3209_s15 = smov 128   ;;  %s3210_s20 = smov 8  }
  0x20   : > { %3018 = dma.hbm_to_vmem [thread:$0]  (!%p3326_p13), %s248_s21, 4096, %s250_s23, %s238_s8, %s3209_s15, %s3209_s15, %s3210_s20  }
  0x21   : > { %p258_p2 = pnand %p2891_p0, %p257_p1 }
  0x23   : > { %261 = sbr.rel (%p258_p2) target bundleno = 1258 (0x4ea), region = 48 }
  0x28   : > { %s3347_s22 = sand.u32 1, %s3199_s25  }
  0x29   : > { %s5057_s10 = sshll.u32 %s3347_s22, 8  ;;  %s264_s9 = scalar_lea.sflag [#allocation4], %s3347_s22 }
  0x2a   : > { %s3353_s16 = scalar_lea.vmem [#allocation3], %s5057_s10 }
  0x2b   : > { %3186 = dma.done.wait (%p3304_p6), %s264_s9, 4096  }
  0x2c   : > { %3188 = vsyncadd (%p3304_p6), %s264_s9, 4294963200  ;;  %v334_v0 = vld [vmem:[%s5050_s1 + $0x18] sm:$0xff]  ;;  %v333_v1 = vld [vmem:[%s5050_s1 + $0x10] sm:$0xff]  ;;  %vm339_vm0 = vcmask 261120   ;;  %vm581_vm1 = vcmask 64512   ;;  %v3211_v20 = vmov 0.0  }
  0x2d   : > { %448 = vmatpush.msra.mxu0 %v334_v0  ;;  %2997 = vmatpush.msra.mxu3 %v334_v0  ;;  %v332_v2 = vld [vmem:[%s5050_s1 + $0x8] sm:$0xff]  ;;  %v331_v3 = vld [vmem:[%s5050_s1] sm:$0xff]  ;;  %v299_v4 = vld [vmem:[%s3353_s16] sm:$0xff]  ;;  %582 = vst.msk [vmem:[#allocation2] sm:$0xff] %vm581_vm1, %v3211_v20  ;;  %vm584_vm2 = vcmask 58368   ;;  %s3212_s19 = smov 8  }
  0x2e   : > { %v324_v5 = vld [vmem:[%s3353_s16 + $0xc8] sm:$0xff]  ;;  %v325_v7 = vld [vmem:[%s3353_s16 + $0xd0] sm:$0xff]  ;;  %v326_v9 = vld [vmem:[%s3353_s16 + $0xd8] sm:$0xff]  ;;  %583 = vst.msk [vmem:[#allocation2 + $0x8] sm:$0xff] %vm581_vm1, %v3211_v20  ;;  %vm591_vm3 = vcmask 57344   ;;  %s5058_s15 = smov 16  }
  0x2f   : > { %449 = vmatpush.msra.mxu0 %v333_v1  ;;  %2998 = vmatpush.msra.mxu3 %v333_v1  ;;  %v300_v6 = vld [vmem:[%s3353_s16 + $0x8] sm:$0xff]  ;;  %v301_v8 = vld [vmem:[%s3353_s16 + $0x10] sm:$0xff]  ;;  %v302_v10 = vld [vmem:[%s3353_s16 + $0x18] sm:$0xff]  ;;  %587 = vst.msk [vmem:[#allocation2 + $0x198] sm:$0xff] %vm581_vm1, %v3211_v20  ;;  %s3214_s21 = smov 24   ;;  %s3215_s23 = smov 32  }
  0x30   : > { %v303_v11 = vld [vmem:[%s3353_s16 + $0x20] sm:$0xff]  ;;  %v304_v13 = vld [vmem:[%s3353_s16 + $0x28] sm:$0xff]  ;;  %v305_v15 = vld [vmem:[%s3353_s16 + $0x30] sm:$0xff]  ;;  %588 = vst.msk [vmem:[#allocation2 + $0x1a0] sm:$0xff] %vm581_vm1, %v3211_v20  ;;  %s3216_s29 = smov 48   ;;  %s3217_s8 = smov 40  }
  0x31   : > { %450 = vmatpush.msra.mxu0 %v332_v2  ;;  %2999 = vmatpush.msra.mxu3 %v332_v2  ;;  %v327_v12 = vld [vmem:[%s3353_s16 + $0xe0] sm:$0xff]  ;;  %v328_v14 = vld [vmem:[%s3353_s16 + $0xe8] sm:$0xff]  ;;  %v306_v16 = vld [vmem:[%s3353_s16 + $0x38] sm:$0xff]  ;;  %585 = vst.msk [vmem:[#allocation2 + $0x10] sm:$0x3] %vm584_vm2, %v3211_v20  ;;  %s3218_s17 = smov 56  }
  0x32   : > { %v307_v17 = vld [vmem:[%s3353_s16 + $0x40] sm:$0xff]  ;;  %v308_v18 = vld [vmem:[%s3353_s16 + $0x48] sm:$0xff]  ;;  %v309_v19 = vld [vmem:[%s3353_s16 + $0x50] sm:$0xff]  ;;  %589 = vst.msk [vmem:[#allocation2 + $0x1a8] sm:$0x3] %vm584_vm2, %v3211_v20  ;;  %s3219_s11 = smov 64  }
  0x33   : > { %451 = vmatpush.msra.mxu0 %v331_v3  ;;  %3000 = vmatpush.msra.mxu3 %v331_v3  ;;  %v310_v21 = vld [vmem:[%s3353_s16 + $0x58] sm:$0xff]  ;;  %v311_v23 = vld [vmem:[%s3353_s16 + $0x60] sm:$0xff]  ;;  %620 = vst.msk [vmem:[#allocation2 + $0x149] sm:$0x1] %vm591_vm3, %v3211_v20  ;;  %v312_v25 = vld [vmem:[%s3353_s16 + $0x68] sm:$0xff]  ;;  %s5085_s12 = smov 16  }
  0x34   : > { %2894 = vmatmul.msk.f32.vlgmr.msra.gmra.mxu0 %vm339_vm0, %v299_v4  ;;  %2919 = vmatmul.msk.f32.vlgmr.msra.gmra.mxu3 %vm339_vm0, %v324_v5  ;;  %592 = vst.msk [vmem:[#allocation2 + $0x18] sm:$0x1] %vm591_vm3, %v3211_v20  ;;  %v313_v28 = vld [vmem:[%s3353_s16 + $0x70] sm:$0xff]  ;;  %v314_v29 = vld [vmem:[%s3353_s16 + $0x78] sm:$0xff]  ;;  %v315_v32 = vld [vmem:[%s3353_s16 + $0x80] sm:$0xff]  ;;  %vm2001_vm4 = vcmask 130048  }
  0x35   : > { %v688_v22 = vld [vmem:[#allocation2 + $0x1] sm:$0xff]  ;;  %593 = vst.msk [vmem:[#allocation2 + $0x30] sm:$0x1] %vm591_vm3, %v3211_v20  ;;  %v3478_v30 = vld [vmem:[%s5051_s2] ss:$0 sm:$0xff]  ;;  %v316_v38 = vld [vmem:[%s3353_s16 + $0x88] sm:$0xff] }
  0x36   : > { %977 = vrot.lane.b32.xlu0 %v688_v22, %s3212_s19  ;;  %594 = vst.msk [vmem:[#allocation2 + $0x48] sm:$0x1] %vm591_vm3, %v3211_v20  ;;  %v720_v27 = vld [vmem:[#allocation2 + $0x2] sm:$0xff]  ;;  %v319_v1 = vld [vmem:[%s3353_s16 + $0xa0] sm:$0xff]  ;;  %vm2034_vm5 = vcmask 195584   ;;  %vm2099_vm6 = vcmask 326656  }
  0x37   : > { %595 = vst.msk [vmem:[#allocation2 + $0x60] sm:$0x1] %vm591_vm3, %v3211_v20  ;;  %1105 = vrot.lane.b32.xlu2 %v720_v27, %s5058_s15  ;;  %v317_v47 = vld [vmem:[%s3353_s16 + $0x90] sm:$0xff]  ;;  %v318_v59 = vld [vmem:[%s3353_s16 + $0x98] sm:$0xff]  ;;  %vm2132_vm7 = vcmask 392192   ;;  %vm2165_vm8 = vcmask 457728  }
  0x38   : > { %v689_v24 = vld [vmem:[#allocation2 + $0x9] sm:$0xff]  ;;  %596 = vst.msk [vmem:[#allocation2 + $0x78] sm:$0x1] %vm591_vm3, %v3211_v20  ;;  %vm2198_vm9 = vcmask 523264   ;;  %vm2244_vm10 = vcmask 588800   ;;  %s5117_s18 = sshll.u32 %s3347_s22, 8 }
  0x39   : > { %v721_v26 = vld [vmem:[#allocation2 + $0xa] sm:$0xff]  ;;  %597 = vst.msk [vmem:[#allocation2 + $0x90] sm:$0x1] %vm591_vm3, %v3211_v20  ;;  %s4331_s20 = scalar_lea.vmem [#allocation6], %s5117_s18 }
  0x3a   : > { %598 = vst.msk [vmem:[#allocation2 + $0xa8] sm:$0x1] %vm591_vm3, %v3211_v20  ;;  %s2809_s18 = sshll.u32 %s4331_s20, 4  ;;  %s2810_s18 = int_to_ptr.vmem [resolvable:$true] %s2809_s18 }
  0x3b   : > { %599 = vst.msk [vmem:[#allocation2 + $0xc0] sm:$0x1] %vm591_vm3, %v3211_v20 }
  0x3c   : > { %2895 = vmatmul.msk.f32.gmra.mxu0 %vm339_vm0, %v300_v6  ;;  %2920 = vmatmul.msk.f32.gmra.mxu3 %vm339_vm0, %v325_v7  ;;  %600 = vst.msk [vmem:[#allocation2 + $0xd8] sm:$0x1] %vm591_vm3, %v3211_v20 }
  0x3d   : > { %601 = vst.msk [vmem:[#allocation2 + $0xf0] sm:$0x1] %vm591_vm3, %v3211_v20 }
  0x3e   : > { %979 = vrot.lane.b32.xlu0 %v689_v24, %s3212_s19  ;;  %602 = vst.msk [vmem:[#allocation2 + $0x108] sm:$0x1] %vm591_vm3, %v3211_v20 }
  0x3f   : > { %603 = vst.msk [vmem:[#allocation2 + $0x120] sm:$0x1] %vm591_vm3, %v3211_v20 }
  0x40   : > { %604 = vst.msk [vmem:[#allocation2 + $0x138] sm:$0x1] %vm591_vm3, %v3211_v20 }
  0x41   : > { %605 = vst.msk [vmem:[#allocation2 + $0x150] sm:$0x1] %vm591_vm3, %v3211_v20 }
  0x42   : > { %606 = vst.msk [vmem:[#allocation2 + $0x168] sm:$0x1] %vm591_vm3, %v3211_v20 }
  0x43   : > { %607 = vst.msk [vmem:[#allocation2 + $0x180] sm:$0x1] %vm591_vm3, %v3211_v20 }
  0x44   : > { %2896 = vmatmul.msk.f32.gmra.mxu0 %vm339_vm0, %v301_v8  ;;  %2921 = vmatmul.msk.f32.gmra.mxu3 %vm339_vm0, %v326_v9  ;;  %608 = vst.msk [vmem:[#allocation2 + $0x29] sm:$0x1] %vm591_vm3, %v3211_v20  ;;  %v320_v8 = vld [vmem:[%s3353_s16 + $0xa8] sm:$0xff] }
  0x45   : > { %609 = vst.msk [vmem:[#allocation2 + $0x41] sm:$0x1] %vm591_vm3, %v3211_v20 }
  0x46   : > { %1107 = vrot.lane.b32.xlu0 %v721_v26, %s5058_s15  ;;  %610 = vst.msk [vmem:[#allocation2 + $0x59] sm:$0x1] %vm591_vm3, %v3211_v20 }
  0x47   : > { %611 = vst.msk [vmem:[#allocation2 + $0x71] sm:$0x1] %vm591_vm3, %v3211_v20 }
  0x48   : > { %612 = vst.msk [vmem:[#allocation2 + $0x89] sm:$0x1] %vm591_vm3, %v3211_v20 }
  0x49   : > { %613 = vst.msk [vmem:[#allocation2 + $0xa1] sm:$0x1] %vm591_vm3, %v3211_v20 }
  0x4a   : > { %614 = vst.msk [vmem:[#allocation2 + $0xb9] sm:$0x1] %vm591_vm3, %v3211_v20 }
  0x4b   : > { %615 = vst.msk [vmem:[#allocation2 + $0xd1] sm:$0x1] %vm591_vm3, %v3211_v20 }
  0x4c   : > { %2897 = vmatmul.msk.f32.gmra.mxu0 %vm339_vm0, %v302_v10  ;;  %2922 = vmatmul.msk.f32.gmra.mxu3 %vm339_vm0, %v327_v12  ;;  %616 = vst.msk [vmem:[#allocation2 + $0xe9] sm:$0x1] %vm591_vm3, %v3211_v20 }
  0x4d   : > { %617 = vst.msk [vmem:[#allocation2 + $0x101] sm:$0x1] %vm591_vm3, %v3211_v20 }
  0x4e   : > { %618 = vst.msk [vmem:[#allocation2 + $0x119] sm:$0x1] %vm591_vm3, %v3211_v20 }
  0x4f   : > { %619 = vst.msk [vmem:[#allocation2 + $0x131] sm:$0x1] %vm591_vm3, %v3211_v20 }
  0x50   : > { %621 = vst.msk [vmem:[#allocation2 + $0x161] sm:$0x1] %vm591_vm3, %v3211_v20 }
  0x51   : > { %622 = vst.msk [vmem:[#allocation2 + $0x179] sm:$0x1] %vm591_vm3, %v3211_v20 }
  0x52   : > { %623 = vst.msk [vmem:[#allocation2 + $0x191] sm:$0x1] %vm591_vm3, %v3211_v20 }
  0x54   : > { %2898 = vmatmul.msk.f32.gmra.mxu0 %vm339_vm0, %v303_v11  ;;  %2923 = vmatmul.msk.f32.gmra.mxu3 %vm339_vm0, %v328_v14 }
  0x5c   : > { %2899 = vmatmul.msk.f32.gmra.mxu0 %vm339_vm0, %v304_v13 }
  0x64   : > { %2900 = vmatmul.msk.f32.gmra.mxu0 %vm339_vm0, %v305_v15  ;;  %v321_v15 = vld [vmem:[%s3353_s16 + $0xb0] sm:$0xff] }
  0x6c   : > { %2901 = vmatmul.msk.f32.gmra.mxu0 %vm339_vm0, %v306_v16 }
  0x74   : > { %2902 = vmatmul.msk.f32.gmra.mxu0 %vm339_vm0, %v307_v17 }
  0x7c   : > { %2903 = vmatmul.msk.f32.gmra.mxu0 %vm339_vm0, %v308_v18 }
  0x84   : > { %2904 = vmatmul.msk.f32.gmra.mxu0 %vm339_vm0, %v309_v19 }
  0x8c   : > { %2905 = vmatmul.msk.f32.gmra.mxu0 %vm339_vm0, %v310_v21 }
  0x94   : > { %2906 = vmatmul.msk.f32.gmra.mxu0 %vm339_vm0, %v311_v23  ;;  %v322_v23 = vld [vmem:[%s3353_s16 + $0xb8] sm:$0xff] }
  0x9c   : > { %2907 = vmatmul.msk.f32.gmra.mxu0 %vm339_vm0, %v312_v25 }
  0xa4   : > { %2908 = vmatmul.msk.f32.gmra.mxu0 %vm339_vm0, %v313_v28 }
  0xac   : > { %2909 = vmatmul.msk.f32.gmra.mxu0 %vm339_vm0, %v314_v29 }
  0xb1   : > { %v453_v31 = vpop.f32.mrf.mxu0 }
  0xb2   : > { %v454_v33 = vadd.f32 %v3478_v30, %v453_v31  ;;  %v323_v31 = vld [vmem:[%s3353_s16 + $0xc0] sm:$0xff] }
  0xb4   : > { %v549_v34 = vmax.f32 %v454_v33, 0.0  ;;  %2910 = vmatmul.msk.f32.gmra.mxu0 %vm339_vm0, %v315_v32 }
  0xb6   : > { %624 = vst.msk [vmem:[#allocation2 + $0x19] sm:$0xff] %vm581_vm1, %v549_v34 }
  0xb7   : > { %v528_v35 = vpop.f32.mrf.mxu3 }
  0xb8   : > { %v529_v36 = vadd.f32 %v3478_v30, %v528_v35 }
  0xb9   : > { %v456_v37 = vpop.f32.mrf.mxu0 }
  0xba   : > { %v574_v39 = vmax.f32 %v529_v36, 0.0  ;;  %v457_v40 = vadd.f32 %v3478_v30, %v456_v37 }
  0xbc   : > { %649 = vst.msk [vmem:[#allocation2 + $0x141] sm:$0xff] %vm581_vm1, %v574_v39  ;;  %v550_v41 = vmax.f32 %v457_v40, 0.0  ;;  %2911 = vmatmul.msk.f32.gmra.mxu0 %vm339_vm0, %v316_v38 }
  0xbd   : > { %v690_v42 = vld [vmem:[#allocation2 + $0x19] sm:$0xff] }
  0xbe   : > { %625 = vst.msk [vmem:[#allocation2 + $0x21] sm:$0xff] %vm581_vm1, %v550_v41  ;;  %981 = vrot.lane.b32.xlu1 %v690_v42, %s3212_s19  ;;  %v3514_v52 = vld [vmem:[#allocation2 + $0x18] sm:$0xff] }
  0xbf   : > { %v531_v43 = vpop.f32.mrf.mxu3 }
  0xc0   : > { %v532_v44 = vadd.f32 %v3478_v30, %v531_v43 }
  0xc1   : > { %v459_v45 = vpop.f32.mrf.mxu0 }
  0xc2   : > { %v460_v46 = vadd.f32 %v3478_v30, %v459_v45  ;;  %v575_v48 = vmax.f32 %v532_v44, 0.0 }
  0xc3   : > { %v747_v49 = vld [vmem:[#allocation2 + $0x142] sm:$0xff] }
  0xc4   : > { %v715_v50 = vld [vmem:[#allocation2 + $0x141] sm:$0xff]  ;;  %v551_v51 = vmax.f32 %v460_v46, 0.0  ;;  %1159 = vrot.lane.b32.xlu2 %v747_v49, %s5058_s15  ;;  %650 = vst.msk [vmem:[#allocation2 + $0x151] sm:$0xff] %vm581_vm1, %v575_v48  ;;  %2912 = vmatmul.msk.f32.gmra.mxu0 %vm339_vm0, %v317_v47 }
  0xc5   : > { %1031 = vrot.lane.b32.xlu0 %v715_v50, %s3212_s19  ;;  %v785_v56 = vld [vmem:[#allocation2 + $0x21] sm:$0xff] }
  0xc6   : > { %626 = vst.msk [vmem:[#allocation2 + $0x31] sm:$0xff] %vm581_vm1, %v551_v51  ;;  %1233 = vrot.lane.b32.xlu1 %v3514_v52, %s3214_s21  ;;  %v723_v57 = vld [vmem:[#allocation2 + $0x22] sm:$0xff]  ;;  %v816_v10 = vld [vmem:[#allocation2 + $0x1a] sm:$0xff]  ;;  %v3596_v51 = vpop.permute.xlu2 %1105 }
  0xc7   : > { %v534_v53 = vpop.f32.mrf.mxu3  ;;  %v3532_v2 = vld [vmem:[#allocation2 + $0x20] sm:$0xff] }
  0xc8   : > { %v535_v54 = vadd.f32 %v3478_v30, %v534_v53  ;;  %v3600_v53 = vpop.permute.xlu0 %977 }
  0xc9   : > { %v462_v55 = vpop.f32.mrf.mxu0 }
  0xca   : > { %v463_v58 = vadd.f32 %v3478_v30, %v462_v55  ;;  %v576_v60 = vmax.f32 %v535_v54, 0.0 }
  0xcb   : > { %v716_v26 = vld [vmem:[#allocation2 + $0x151] sm:$0xff] }
  0xcc   : > { %v552_v61 = vmax.f32 %v463_v58, 0.0  ;;  %1111 = vrot.lane.b32.xlu2 %v723_v57, %s5058_s15  ;;  %651 = vst.msk [vmem:[#allocation2 + $0x159] sm:$0xff] %vm581_vm1, %v576_v60  ;;  %2913 = vmatmul.msk.f32.gmra.mxu0 %vm339_vm0, %v318_v59 }
  0xcd   : > { %1363 = vrot.lane.b32.xlu0 %v785_v56, %s3215_s23  ;;  %v3528_v63 = vld [vmem:[#allocation2 + $0x30] sm:$0xff] }
  0xce   : > { %627 = vst.msk [vmem:[#allocation2 + $0x39] sm:$0xff] %vm581_vm1, %v552_v61  ;;  %1361 = vrot.lane.b32.xlu1 %v690_v42, %s3215_s23  ;;  %v692_v16 = vld [vmem:[#allocation2 + $0x31] sm:$0xff] }
  0xcf   : > { %v537_v4 = vpop.f32.mrf.mxu3 }
  0xd0   : > { %v538_v5 = vadd.f32 %v3478_v30, %v537_v4 }
  0xd1   : > { %v465_v62 = vpop.f32.mrf.mxu0 }
  0xd2   : > { %v466_v0 = vadd.f32 %v3478_v30, %v465_v62  ;;  %v577_v9 = vmax.f32 %v538_v5, 0.0 }
  0xd3   : > { %v748_v13 = vld [vmem:[#allocation2 + $0x152] sm:$0xff]  ;;  %v749_v37 = vld [vmem:[#allocation2 + $0x15a] sm:$0xff] }
  0xd4   : > { %v553_v3 = vmax.f32 %v466_v0, 0.0  ;;  %1235 = vrot.lane.b32.xlu2 %v3532_v2, %s3214_s21  ;;  %2914 = vmatmul.msk.f32.gmra.mxu0 %vm339_vm0, %v319_v1  ;;  %652 = vst.msk [vmem:[#allocation2 + $0x169] sm:$0xff] %vm581_vm1, %v577_v9  ;;  %v717_v32 = vld [vmem:[#allocation2 + $0x159] sm:$0xff]  ;;  %v3613_v0 = vpop.permute.xlu0 %979 }
  0xd5   : > { %1237 = vrot.lane.b32.xlu0 %v3528_v63, %s3214_s21  ;;  %v724_v24 = vld [vmem:[#allocation2 + $0x32] sm:$0xff]  ;;  %v725_v42 = vld [vmem:[#allocation2 + $0x3a] sm:$0xff] }
  0xd6   : > { %628 = vst.msk [vmem:[#allocation2 + $0x49] sm:$0xff] %vm581_vm1, %v553_v3  ;;  %983 = vrot.lane.b32.xlu1 %v785_v56, %s3212_s19  ;;  %v882_v28 = vld [vmem:[#allocation2 + $0x39] sm:$0xff] }
  0xd7   : > { %v540_v18 = vpop.f32.mrf.mxu3  ;;  %v3585_v46 = vld [vmem:[#allocation2 + $0x38] sm:$0xff] }
  0xd8   : > { %v541_v19 = vadd.f32 %v3478_v30, %v540_v18 }
  0xd9   : > { %v468_v6 = vpop.f32.mrf.mxu0 }
  0xda   : > { %v469_v7 = vadd.f32 %v3478_v30, %v468_v6  ;;  %v578_v20 = vmax.f32 %v541_v19, 0.0 }
  0xdb   : > { %v718_v39 = vld [vmem:[#allocation2 + $0x169] sm:$0xff] }
  0xdc   : > { %v554_v11 = vmax.f32 %v469_v7, 0.0  ;;  %1489 = vrot.lane.b32.xlu2 %v816_v10, %s3217_s8  ;;  %2915 = vmatmul.msk.f32.gmra.mxu0 %vm339_vm0, %v320_v8  ;;  %653 = vst.msk [vmem:[#allocation2 + $0x171] sm:$0xff] %vm581_vm1, %v578_v20  ;;  %v3628_v9 = vpop.permute.xlu0 %1107 }
  0xdd   : > { %1617 = vrot.lane.b32.xlu0 %v3528_v63, %s3216_s29  ;;  %v694_v44 = vld [vmem:[#allocation2 + $0x49] sm:$0xff] }
  0xde   : > { %629 = vst.msk [vmem:[#allocation2 + $0x51] sm:$0xff] %vm581_vm1, %v554_v11  ;;  %1109 = vrot.lane.b32.xlu1 %v816_v10, %s5058_s15 }
  0xe1   : > { %v471_v12 = vpop.f32.mrf.mxu0 }
  0xe2   : > { %v472_v14 = vadd.f32 %v3478_v30, %v471_v12 }
  0xe3   : > { %v751_v55 = vld [vmem:[#allocation2 + $0x172] sm:$0xff]  ;;  %v750_v7 = vld [vmem:[#allocation2 + $0x16a] sm:$0xff] }
  0xe4   : > { %v555_v17 = vmax.f32 %v472_v14, 0.0  ;;  %985 = vrot.lane.b32.xlu2 %v692_v16, %s3212_s19  ;;  %2916 = vmatmul.msk.f32.gmra.mxu0 %vm339_vm0, %v321_v15  ;;  %v719_v10 = vld [vmem:[#allocation2 + $0x171] sm:$0xff] }
  0xe5   : > { %1161 = vrot.lane.b32.xlu0 %v748_v13, %s5058_s15  ;;  %v727_v61 = vld [vmem:[#allocation2 + $0x52] sm:$0xff]  ;;  %v915_v15 = vld [vmem:[#allocation2 + $0x4a] sm:$0xff] }
  0xe6   : > { %630 = vst.msk [vmem:[#allocation2 + $0x61] sm:$0xff] %vm581_vm1, %v555_v17  ;;  %1491 = vrot.lane.b32.xlu1 %v723_v57, %s3217_s8  ;;  %v3603_v57 = vld [vmem:[#allocation2 + $0x48] sm:$0xff]  ;;  %v3623_v6 = vld [vmem:[#allocation2 + $0x50] sm:$0xff] }
  0xe7   : > { %v695_v17 = vld [vmem:[#allocation2 + $0x51] sm:$0xff] }
  0xe9   : > { %v474_v21 = vpop.f32.mrf.mxu0 }
  0xea   : > { %v475_v22 = vadd.f32 %v3478_v30, %v474_v21 }
  0xec   : > { %v556_v25 = vmax.f32 %v475_v22, 0.0  ;;  %1365 = vrot.lane.b32.xlu2 %v692_v16, %s3215_s23  ;;  %2917 = vmatmul.msk.f32.gmra.mxu0 %vm339_vm0, %v322_v23  ;;  %v2239_v23 = vld [vmem:[%s5052_s3 + $0x40] sm:$0xff] }
  0xed   : > { %1113 = vrot.lane.b32.xlu0 %v724_v24, %s5058_s15  ;;  %2348 = vmatpush.msra.mxu1 %v2239_v23 }
  0xee   : > { %631 = vst.msk [vmem:[#allocation2 + $0x69] sm:$0xff] %vm581_vm1, %v556_v25  ;;  %1033 = vrot.lane.b32.xlu1 %v716_v26, %s3212_s19  ;;  %3001 = vmatpush.msrb.mxu3 %v2239_v23  ;;  %v2238_v25 = vld [vmem:[%s5052_s3 + $0x38] sm:$0xff] }
  0xef   : > { %2349 = vmatpush.msra.mxu1 %v2238_v25 }
  0xf0   : > { %3002 = vmatpush.msrb.mxu3 %v2238_v25 }
  0xf1   : > { %v477_v27 = vpop.f32.mrf.mxu0 }
  0xf2   : > { %v478_v29 = vadd.f32 %v3478_v30, %v477_v27 }
  0xf4   : > { %v557_v33 = vmax.f32 %v478_v29, 0.0  ;;  %1035 = vrot.lane.b32.xlu2 %v717_v32, %s3212_s19  ;;  %2918 = vmatmul.msk.f32.gmra.mxu0 %vm339_vm0, %v323_v31  ;;  %v2236_v29 = vld [vmem:[%s5052_s3 + $0x28] sm:$0xff] }
  0xf5   : > { %1747 = vrot.lane.b32.xlu0 %v882_v28, %s3218_s17  ;;  %v3737_v25 = vld [vmem:[#allocation2 + $0x68] sm:$0xff] }
  0xf6   : > { %632 = vst.msk [vmem:[#allocation2 + $0x79] sm:$0xff] %vm581_vm1, %v557_v33  ;;  %1745 = vrot.lane.b32.xlu1 %v692_v16, %s3218_s17  ;;  %v2235_v33 = vld [vmem:[%s5052_s3 + $0x20] sm:$0xff] }
  0xf9   : > { %v480_v34 = vpop.f32.mrf.mxu0 }
  0xfa   : > { %v481_v35 = vadd.f32 %v3478_v30, %v480_v34 }
  0xfc   : > { %v558_v36 = vmax.f32 %v481_v35, 0.0  ;;  %987 = vrot.lane.b32.xlu2 %v882_v28, %s3212_s19  ;;  %v2234_v35 = vld [vmem:[%s5052_s3 + $0x18] sm:$0xff] }
  0xfd   : > { %1493 = vrot.lane.b32.xlu0 %v724_v24, %s3217_s8 }
  0xfe   : > { %633 = vst.msk [vmem:[#allocation2 + $0x81] sm:$0xff] %vm581_vm1, %v558_v36  ;;  %1163 = vrot.lane.b32.xlu1 %v749_v37, %s5058_s15 }
 0x101   : > { %v483_v38 = vpop.f32.mrf.mxu0 }
 0x102   : > { %v484_v40 = vadd.f32 %v3478_v30, %v483_v38 }
 0x104   : > { %v559_v41 = vmax.f32 %v484_v40, 0.0  ;;  %1873 = vrot.lane.b32.xlu2 %v724_v24, %s3219_s11  ;;  %v2232_v40 = vld [vmem:[%s5052_s3 + $0x8] sm:$0xff] }
 0x105   : > { %1037 = vrot.lane.b32.xlu0 %v718_v39, %s3212_s19  ;;  %v2233_v39 = vld [vmem:[%s5052_s3 + $0x10] sm:$0xff] }
 0x106   : > { %634 = vst.msk [vmem:[#allocation2 + $0x91] sm:$0xff] %vm581_vm1, %v559_v41  ;;  %1115 = vrot.lane.b32.xlu1 %v725_v42, %s5058_s15 }
 0x109   : > { %v486_v43 = vpop.f32.mrf.mxu0 }
 0x10a   : > { %v487_v45 = vadd.f32 %v3478_v30, %v486_v43 }
 0x10c   : > { %v560_v47 = vmax.f32 %v487_v45, 0.0  ;;  %1619 = vrot.lane.b32.xlu2 %v3585_v46, %s3216_s29 }
 0x10d   : > { %989 = vrot.lane.b32.xlu0 %v694_v44, %s3212_s19 }
 0x10e   : > { %635 = vst.msk [vmem:[#allocation2 + $0x99] sm:$0xff] %vm581_vm1, %v560_v47  ;;  %1239 = vrot.lane.b32.xlu1 %v3585_v46, %s3214_s21  ;;  %v3698_v47 = vld [vmem:[#allocation2 + $0x60] sm:$0xff] }
 0x111   : > { %v489_v48 = vpop.f32.mrf.mxu0 }
 0x112   : > { %v490_v49 = vadd.f32 %v3478_v30, %v489_v48 }
 0x114   : > { %v561_v50 = vmax.f32 %v490_v49, 0.0  ;;  %1495 = vrot.lane.b32.xlu2 %v725_v42, %s3217_s8 }
 0x115   : > { %1369 = vrot.lane.b32.xlu0 %v694_v44, %s3215_s23 }
 0x116   : > { %636 = vst.msk [vmem:[#allocation2 + $0xa9] sm:$0xff] %vm581_vm1, %v561_v50  ;;  %1875 = vrot.lane.b32.xlu1 %v725_v42, %s3219_s11  ;;  %v885_v42 = vld [vmem:[#allocation2 + $0x61] sm:$0xff] }
 0x119   : > { %v492_v54 = vpop.f32.mrf.mxu0 }
 0x11a   : > { %v493_v56 = vadd.f32 %v3478_v30, %v492_v54 }
 0x11c   : > { %v562_v58 = vmax.f32 %v493_v56, 0.0  ;;  %1241 = vrot.lane.b32.xlu2 %v3603_v57, %s3214_s21 }
 0x11d   : > { %1167 = vrot.lane.b32.xlu0 %v751_v55, %s5058_s15  ;;  %v697_v55 = vld [vmem:[#allocation2 + $0x69] sm:$0xff] }
 0x11e   : > { %637 = vst.msk [vmem:[#allocation2 + $0xb1] sm:$0xff] %vm581_vm1, %v562_v58  ;;  %v3609_v59 = vpop.permute.xlu2 %1159  ;;  %1367 = vrot.lane.b32.xlu1 %v882_v28, %s3215_s23  ;;  %v2237_v28 = vld [vmem:[%s5052_s3 + $0x30] sm:$0xff] }
 0x11f   : > { %5081 = vst [vmem:[#allocation10_spill] sm:$0xff] %v3609_v59  ;;  %2350 = vmatpush.msra.mxu1 %v2237_v28  ;;  %3003 = vmatpush.msrb.mxu3 %v2237_v28 }
 0x121   : > { %v495_v60 = vpop.f32.mrf.mxu0  ;;  %2351 = vmatpush.msra.mxu1 %v2236_v29  ;;  %3004 = vmatpush.msrb.mxu3 %v2236_v29 }
 0x122   : > { %v496_v62 = vadd.f32 %v3478_v30, %v495_v60 }
 0x123   : > { %2352 = vmatpush.msra.mxu1 %v2235_v33  ;;  %3005 = vmatpush.msrb.mxu3 %v2235_v33 }
 0x124   : > { %v563_v1 = vmax.f32 %v496_v62, 0.0  ;;  %1749 = vrot.lane.b32.xlu2 %v694_v44, %s3218_s17  ;;  %v2231_v44 = vld [vmem:[%s5052_s3] sm:$0xff] }
 0x125   : > { %1119 = vrot.lane.b32.xlu0 %v727_v61, %s5058_s15  ;;  %2353 = vmatpush.msra.mxu1 %v2234_v35 }
 0x126   : > { %638 = vst.msk [vmem:[#allocation2 + $0xc1] sm:$0xff] %vm581_vm1, %v563_v1  ;;  %v3618_v3 = vpop.permute.xlu2 %1111  ;;  %1621 = vrot.lane.b32.xlu1 %v3603_v57, %s3216_s29  ;;  %3006 = vmatpush.msrb.mxu3 %v2234_v35 }
 0x127   : > { %2354 = vmatpush.msra.mxu1 %v2233_v39 }
 0x128   : > { %3007 = vmatpush.msrb.mxu3 %v2233_v39 }
 0x129   : > { %v498_v4 = vpop.f32.mrf.mxu0  ;;  %2355 = vmatpush.msra.mxu1 %v2232_v40 }
 0x12a   : > { %v499_v5 = vadd.f32 %v3478_v30, %v498_v4  ;;  %3008 = vmatpush.msrb.mxu3 %v2232_v40  ;;  %v918_v4 = vld [vmem:[#allocation2 + $0x6a] sm:$0xff] }
 0x12b   : > { %2356 = vmatpush.msra.mxu1 %v2231_v44 }
 0x12c   : > { %v564_v8 = vmax.f32 %v499_v5, 0.0  ;;  %1165 = vrot.lane.b32.xlu2 %v750_v7, %s5058_s15  ;;  %3009 = vmatpush.msrb.mxu3 %v2231_v44 }
 0x12d   : > { %1243 = vrot.lane.b32.xlu0 %v3623_v6, %s3214_s21 }
 0x12e   : > { %639 = vst.msk [vmem:[#allocation2 + $0xc9] sm:$0xff] %vm581_vm1, %v564_v8  ;;  %v3631_v11 = vpop.permute.xlu2 %1235  ;;  %1039 = vrot.lane.b32.xlu1 %v719_v10, %s3212_s19  ;;  %v656_v8 = vld [vmem:[#allocation2] sm:$0xff] }
 0x130   : > { %v3634_v12 = vpop.permute.xlu1 %981 }
 0x131   : > { %v501_v13 = vpop.f32.mrf.mxu0 }
 0x132   : > { %v502_v14 = vadd.f32 %v3478_v30, %v501_v13  ;;  %v728_v13 = vld [vmem:[#allocation2 + $0x62] sm:$0xff] }
 0x134   : > { %v565_v16 = vmax.f32 %v502_v14, 0.0  ;;  %1117 = vrot.lane.b32.xlu2 %v915_v15, %s5058_s15 }
 0x135   : > { %1877 = vrot.lane.b32.xlu0 %v915_v15, %s3219_s11 }
 0x136   : > { %640 = vst.msk [vmem:[#allocation2 + $0xd9] sm:$0xff] %vm581_vm1, %v565_v16  ;;  %v3642_v19 = vpop.permute.xlu2 %1489  ;;  %991 = vrot.lane.b32.xlu1 %v695_v17, %s3212_s19  ;;  %v1969_v16 = vsel %vm581_vm1, %v656_v8, %v3600_v53 }
 0x137   : > { %v3640_v18 = vpop.permute.xlu0 %1031 }
 0x138   : > { %5082 = vst [vmem:[#allocation11_spill] sm:$0xff] %v3640_v18  ;;  %v3645_v20 = vpop.permute.xlu1 %1233 }
 0x139   : > { %v504_v21 = vpop.f32.mrf.mxu0 }
 0x13a   : > { %v505_v22 = vadd.f32 %v3478_v30, %v504_v21  ;;  %v2002_v21 = vsel %vm2001_vm4, %v1969_v16, %v3596_v51 }
 0x13b   : > { %v2035_v23 = vsel %vm2034_vm5, %v2002_v21, %v3645_v20 }
 0x13c   : > { %v566_v24 = vmax.f32 %v505_v22, 0.0  ;;  %1879 = vrot.lane.b32.xlu2 %v727_v61, %s3219_s11 }
 0x13d   : > { %1623 = vrot.lane.b32.xlu0 %v3623_v6, %s3216_s29 }
 0x13e   : > { %641 = vst.msk [vmem:[#allocation2 + $0xe1] sm:$0xff] %vm581_vm1, %v566_v24  ;;  %v3660_v27 = vpop.permute.xlu2 %985  ;;  %1751 = vrot.lane.b32.xlu1 %v695_v17, %s3218_s17 }
 0x13f   : > { %v3658_v26 = vpop.permute.xlu0 %1363 }
 0x140   : > { %v3669_v31 = vpop.permute.xlu1 %1361 }
 0x141   : > { %v507_v32 = vpop.f32.mrf.mxu0  ;;  %v2067_v53 = vsel %vm339_vm0, %v2035_v23, %v3669_v31 }
 0x142   : > { %v508_v34 = vadd.f32 %v3478_v30, %v507_v32  ;;  %v2100_v20 = vsel %vm2099_vm6, %v2067_v53, %v3642_v19 }
 0x144   : > { %1371 = vrot.lane.b32.xlu2 %v695_v17, %s3215_s23  ;;  %v567_v36 = vmax.f32 %v508_v34, 0.0  ;;  %v3750_v34 = vld [vmem:[#allocation2 + $0x78] sm:$0xff] }
 0x145   : > { %1499 = vrot.lane.b32.xlu0 %v727_v61, %s3217_s8  ;;  %5087 = vst [vmem:[#allocation15_spill] sm:$0xff] %v3750_v34 }
 0x146   : > { %v3682_v38 = vpop.permute.xlu2 %1365  ;;  %1497 = vrot.lane.b32.xlu1 %v915_v15, %s3217_s8  ;;  %642 = vst.msk [vmem:[#allocation2 + $0xf1] sm:$0xff] %vm581_vm1, %v567_v36 }
 0x147   : > { %v3680_v37 = vpop.permute.xlu0 %1237 }
 0x148   : > { %v3692_v41 = vpop.permute.xlu1 %983 }
 0x149   : > { %v510_v43 = vpop.f32.mrf.mxu0 }
 0x14a   : > { %v511_v45 = vadd.f32 %v3478_v30, %v510_v43 }
 0x14c   : > { %993 = vrot.lane.b32.xlu2 %v885_v42, %s3212_s19  ;;  %v568_v48 = vmax.f32 %v511_v45, 0.0 }
 0x14d   : > { %1753 = vrot.lane.b32.xlu0 %v885_v42, %s3218_s17 }
 0x14e   : > { %v3702_v50 = vpop.permute.xlu2 %1035  ;;  %1245 = vrot.lane.b32.xlu1 %v3698_v47, %s3214_s21  ;;  %643 = vst.msk [vmem:[#allocation2 + $0xf9] sm:$0xff] %vm581_vm1, %v568_v48 }
 0x14f   : > { %v1618_v49 = vpop.permute.xlu0 %1617  ;;  %5083 = vst [vmem:[#allocation12_spill] sm:$0xff] %v3702_v50  ;;  %v1973_v50 = vsel %vm581_vm1, %v3528_v63, %v3660_v27  ;;  %v3995_v63 = vld [vmem:[#allocation2 + $0xe1] sm:$0xff] }
 0x150   : > { %v3707_v54 = vpop.permute.xlu1 %1109  ;;  %v2133_v31 = vsel %vm2132_vm7, %v2100_v20, %v1618_v49  ;;  %v3828_v20 = vld [vmem:[#allocation2 + $0x80] sm:$0xff] }
 0x151   : > { %v513_v56 = vpop.f32.mrf.mxu0  ;;  %5092 = vst [vmem:[#allocation20_spill] sm:$0xff] %v3828_v20 }
 0x152   : > { %v514_v58 = vadd.f32 %v3478_v30, %v513_v56 }
 0x154   : > { %1625 = vrot.lane.b32.xlu2 %v3698_v47, %s3216_s29  ;;  %v569_v60 = vmax.f32 %v514_v58, 0.0  ;;  %v657_v58 = vld [vmem:[#allocation2 + $0x8] sm:$0xff] }
 0x155   : > { %995 = vrot.lane.b32.xlu0 %v697_v55, %s3212_s19  ;;  %v3982_v59 = vld [vmem:[#allocation2 + $0xf9] sm:$0xff] }
 0x156   : > { %v3715_v62 = vpop.permute.xlu2 %987  ;;  %1373 = vrot.lane.b32.xlu1 %v885_v42, %s3215_s23  ;;  %644 = vst.msk [vmem:[#allocation2 + $0x109] sm:$0xff] %vm581_vm1, %v569_v60  ;;  %v3779_v60 = vld [vmem:[#allocation2 + $0x7a] sm:$0xff] }
 0x157   : > { %v3713_v61 = vpop.permute.xlu0 %1161  ;;  %5094 = vst [vmem:[#allocation22_spill] sm:$0xff] %v3982_v59 }
 0x158   : > { %5084 = vst [vmem:[#allocation13_spill] sm:$0xff] %v3713_v61  ;;  %v3719_v1 = vpop.permute.xlu1 %1491 }
 0x159   : > { %v516_v5 = vpop.f32.mrf.mxu0 }
 0x15a   : > { %v517_v7 = vadd.f32 %v3478_v30, %v516_v5  ;;  %v1970_v5 = vsel %vm581_vm1, %v657_v58, %v3613_v0 }
 0x15c   : > { %1123 = vrot.lane.b32.xlu2 %v918_v4, %s5085_s12  ;;  %v570_v10 = vmax.f32 %v517_v7, 0.0 }
 0x15d   : > { %1883 = vrot.lane.b32.xlu0 %v918_v4, %s3219_s11 }
 0x15e   : > { %v1874_v15 = vpop.permute.xlu2 %1873  ;;  %1121 = vrot.lane.b32.xlu1 %v728_v13, %s5085_s12  ;;  %645 = vst.msk [vmem:[#allocation2 + $0x111] sm:$0xff] %vm581_vm1, %v570_v10 }
 0x15f   : > { %v3724_v14 = vpop.permute.xlu0 %1113 }
 0x160   : > { %v3730_v17 = vpop.permute.xlu1 %1033 }
 0x161   : > { %5086 = vst [vmem:[#allocation14_spill] sm:$0xff] %v3730_v17  ;;  %v519_v22 = vpop.f32.mrf.mxu0  ;;  %v2006_v17 = vsel %vm2001_vm4, %v1973_v50, %v3724_v14 }
 0x162   : > { %v520_v24 = vadd.f32 %v3478_v30, %v519_v22 }
 0x164   : > { %1247 = vrot.lane.b32.xlu2 %v3737_v25, %s3214_s21  ;;  %v571_v28 = vmax.f32 %v520_v24, 0.0  ;;  %v3818_v24 = vld [vmem:[#allocation2 + $0x82] sm:$0xff] }
 0x165   : > { %1375 = vrot.lane.b32.xlu0 %v697_v55, %s3215_s23 }
 0x166   : > { %v1620_v29 = vpop.permute.xlu2 %1619  ;;  %1881 = vrot.lane.b32.xlu1 %v728_v13, %s3219_s11  ;;  %646 = vst.msk [vmem:[#allocation2 + $0x121] sm:$0xff] %vm581_vm1, %v571_v28 }
 0x167   : > { %v1748_v51 = vpop.permute.xlu0 %1747 }
 0x168   : > { %v1746_v32 = vpop.permute.xlu1 %1745 }
 0x169   : > { %v2166_v33 = vsel %vm2165_vm8, %v2133_v31, %v1746_v32  ;;  %v522_v35 = vpop.f32.mrf.mxu0 }
 0x16a   : > { %v2199_v36 = vsel %vm2198_vm9, %v2166_v33, %v1874_v15  ;;  %v523_v39 = vadd.f32 %v3478_v30, %v522_v35  ;;  %v1971_v35 = vsel %vm581_vm1, %v3514_v52, %v3634_v12 }
 0x16b   : > { %2926 = vmatmul.msk.f32.vlgmr.msra.gmra.mxu1 %vm2244_vm10, %v2199_v36  ;;  %v2004_v36 = vsel %vm2001_vm4, %v1971_v35, %v3707_v54  ;;  %v3863_v54 = vld [vmem:[#allocation2 + $0xb1] sm:$0xff] }
 0x16c   : > { %1755 = vrot.lane.b32.xlu2 %v697_v55, %s3218_s17  ;;  %v572_v19 = vmax.f32 %v523_v39, 0.0  ;;  %v3843_v39 = vld [vmem:[#allocation2 + $0x98] sm:$0xff] }
 0x16d   : > { %1249 = vrot.lane.b32.xlu0 %v3750_v34, %s3214_s21 }
 0x16e   : > { %v3760_v42 = vpop.permute.xlu2 %1495  ;;  %1627 = vrot.lane.b32.xlu1 %v3737_v25, %s3216_s29  ;;  %647 = vst.msk [vmem:[#allocation2 + $0x129] sm:$0xff] %vm581_vm1, %v572_v19  ;;  %v3845_v19 = vld [vmem:[#allocation2 + $0x90] sm:$0xff] }
 0x16f   : > { %v3758_v40 = vpop.permute.xlu0 %1493 }
 0x170   : > { %v3765_v43 = vpop.permute.xlu1 %1163 }
 0x171   : > { %5088 = vst [vmem:[#allocation16_spill] sm:$0xff] %v3765_v43  ;;  %v525_v44 = vpop.f32.mrf.mxu0 }
 0x172   : > { %v526_v45 = vadd.f32 %v3478_v30, %v525_v44  ;;  %v792_v30 = vld [vmem:[#allocation2 + $0x79] sm:$0xff]  ;;  %v2037_v44 = vsel %vm2034_vm5, %v2004_v36, %v3680_v37  ;;  %v3908_v36 = vld [vmem:[#allocation2 + $0xc2] sm:$0xff] }
 0x173   : > { %v2069_v12 = vsel %vm339_vm0, %v2037_v44, %v3682_v38  ;;  %v3868_v37 = vld [vmem:[#allocation2 + $0x92] sm:$0xff]  ;;  %v1972_v38 = vsel %vm581_vm1, %v3532_v2, %v3692_v41 }
 0x174   : > { %1501 = vrot.lane.b32.xlu2 %v728_v13, %s3217_s8  ;;  %v573_v48 = vmax.f32 %v526_v45, 0.0  ;;  %v3791_v13 = vld [vmem:[#allocation2 + $0x81] sm:$0xff]  ;;  %v2102_v58 = vsel %vm2099_vm6, %v2069_v12, %v3758_v40  ;;  %v3912_v12 = vld [vmem:[#allocation2 + $0xb2] sm:$0xff] }
 0x175   : > { %1629 = vrot.lane.b32.xlu0 %v3750_v34, %s3216_s29 }
 0x176   : > { %v3773_v55 = vpop.permute.xlu2 %1241  ;;  %1503 = vrot.lane.b32.xlu1 %v918_v4, %s3217_s8  ;;  %648 = vst.msk [vmem:[#allocation2 + $0x139] sm:$0xff] %vm581_vm1, %v573_v48  ;;  %v2003_v4 = vsel %vm2001_vm4, %v1970_v5, %v3628_v9  ;;  %v3874_v5 = vld [vmem:[#allocation2 + $0x99] sm:$0xff] }
 0x177   : > { %v3771_v49 = vpop.permute.xlu0 %1037  ;;  %v2036_v15 = vsel %vm2034_vm5, %v2003_v4, %v3631_v11 }
 0x178   : > { %5089 = vst [vmem:[#allocation17_spill] sm:$0xff] %v3771_v49  ;;  %v3777_v56 = vpop.permute.xlu1 %1115  ;;  %v2068_v0 = vsel %vm339_vm0, %v2036_v15, %v3658_v26 }
 0x179   : > { %v2101_v16 = vsel %vm2099_vm6, %v2068_v0, %v3719_v1  ;;  %v3811_v1 = vld [vmem:[#allocation2 + $0x91] sm:$0xff] }
 0x17a   : > { %v2134_v9 = vsel %vm2132_vm7, %v2101_v16, %v1620_v29  ;;  %v3826_v29 = vld [vmem:[#allocation2 + $0x9a] sm:$0xff] }
 0x17b   : > { %v2167_v26 = vsel %vm2165_vm8, %v2134_v9, %v1748_v51  ;;  %v2005_v9 = vsel %vm2001_vm4, %v1972_v38, %v3618_v3  ;;  %v3926_v38 = vld [vmem:[#allocation2 + $0xd9] sm:$0xff] }
 0x17c   : > { %1377 = vrot.lane.b32.xlu2 %v792_v30, %s3215_s23 }
 0x17d   : > { %1125 = vrot.lane.b32.xlu0 %v3779_v60, %s5085_s12 }
 0x17e   : > { %v1750_v8 = vpop.permute.xlu2 %1749  ;;  %997 = vrot.lane.b32.xlu1 %v792_v30, %s3212_s19 }
 0x17f   : > { %v3786_v7 = vpop.permute.xlu0 %989 }
 0x180   : > { %v1240_v10 = vpop.permute.xlu1 %1239 }
 0x181   : > { %v2038_v2 = vsel %vm2034_vm5, %v2005_v9, %v1240_v10 }
 0x184   : > { %999 = vrot.lane.b32.xlu2 %v3791_v13, %s3212_s19 }
 0x185   : > { %1759 = vrot.lane.b32.xlu0 %v3791_v13, %s3218_s17 }
 0x186   : > { %v3806_v22 = vpop.permute.xlu2 %1165  ;;  %1757 = vrot.lane.b32.xlu1 %v792_v30, %s3218_s17 }
 0x187   : > { %v3804_v21 = vpop.permute.xlu0 %1369  ;;  %5090 = vst [vmem:[#allocation18_spill] sm:$0xff] %v3806_v22  ;;  %v3969_v22 = vld [vmem:[#allocation2 + $0xc8] sm:$0xff] }
 0x188   : > { %v1876_v11 = vpop.permute.xlu1 %1875 }
 0x189   : > { %v2200_v23 = vsel %vm2198_vm9, %v2167_v26, %v1876_v11  ;;  %v3890_v11 = vld [vmem:[#allocation2 + $0xc0] sm:$0xff]  ;;  %v3894_v26 = vld [vmem:[#allocation2 + $0xa9] sm:$0xff] }
 0x18a   : > { %2927 = vmatmul.msk.f32.gmra.mxu1 %vm2244_vm10, %v2200_v23 }
 0x18c   : > { %1885 = vrot.lane.b32.xlu2 %v3779_v60, %s3219_s11 }
 0x18d   : > { %1001 = vrot.lane.b32.xlu0 %v3811_v1, %s3212_s19 }
 0x18e   : > { %v3822_v28 = vpop.permute.xlu2 %1117  ;;  %1127 = vrot.lane.b32.xlu1 %v3818_v24, %s5085_s12 }
 0x18f   : > { %v3820_v53 = vpop.permute.xlu0 %1167 }
 0x190   : > { %5091 = vst [vmem:[#allocation19_spill] sm:$0xff] %v3820_v53  ;;  %v1368_v51 = vpop.permute.xlu1 %1367  ;;  %v3960_v53 = vld [vmem:[#allocation2 + $0xd8] sm:$0xff] }
 0x191   : > { %v2070_v41 = vsel %vm339_vm0, %v2038_v2, %v1368_v51 }
 0x192   : > { %v2103_v3 = vsel %vm2099_vm6, %v2070_v41, %v3760_v42  ;;  %v3918_v42 = vld [vmem:[#allocation2 + $0xaa] sm:$0xff]  ;;  %v3942_v41 = vld [vmem:[#allocation2 + $0xe2] sm:$0xff] }
 0x194   : > { %1631 = vrot.lane.b32.xlu2 %v3828_v20, %s3216_s29 }
 0x195   : > { %1131 = vrot.lane.b32.xlu0 %v3826_v29, %s5085_s12 }
 0x196   : > { %v1880_v32 = vpop.permute.xlu2 %1879  ;;  %1251 = vrot.lane.b32.xlu1 %v3828_v20, %s3214_s21  ;;  %v3988_v20 = vld [vmem:[#allocation2 + $0xda] sm:$0xff] }
 0x197   : > { %v3834_v31 = vpop.permute.xlu0 %1119 }
 0x198   : > { %v1622_v33 = vpop.permute.xlu1 %1621 }
 0x199   : > { %v2135_v30 = vsel %vm2132_vm7, %v2102_v58, %v1622_v33 }
 0x19a   : > { %v2168_v40 = vsel %vm2165_vm8, %v2135_v30, %v1750_v8  ;;  %v3900_v8 = vld [vmem:[#allocation2 + $0xa8] sm:$0xff] }
 0x19c   : > { %1253 = vrot.lane.b32.xlu2 %v3845_v19, %s3214_s21 }
 0x19d   : > { %1255 = vrot.lane.b32.xlu0 %v3843_v39, %s3214_s21 }
 0x19e   : > { %v3855_v48 = vpop.permute.xlu2 %1371  ;;  %1887 = vrot.lane.b32.xlu1 %v3818_v24, %s3219_s11 }
 0x19f   : > { %v3853_v45 = vpop.permute.xlu0 %1243 }
 0x1a0   : > { %v3859_v52 = vpop.permute.xlu1 %1039 }
 0x1a1   : > { %5093 = vst [vmem:[#allocation21_spill] sm:$0xff] %v3859_v52  ;;  %v2486_v52 = vld [vmem:[%s5054_s5] sm:$0xff] }
 0x1a2   : > { %2602 = vmatpush.msra.mxu2 %v2486_v52  ;;  %3010 = vmatpush.msra.mxu3 %v2486_v52  ;;  %v2039_v52 = vsel %vm2034_vm5, %v2006_v17, %v3773_v55 }
 0x1a3   : > { %v2071_v18 = vsel %vm339_vm0, %v2039_v52, %v3804_v21  ;;  %v4006_v21 = vld [vmem:[#allocation2 + $0x108] sm:$0xff] }
 0x1a4   : > { %1129 = vrot.lane.b32.xlu2 %v3868_v37, %s5085_s12 }
 0x1a5   : > { %1007 = vrot.lane.b32.xlu0 %v3863_v54, %s3212_s19 }
 0x1a6   : > { %v3879_v15 = vpop.permute.xlu2 %993  ;;  %1003 = vrot.lane.b32.xlu1 %v3874_v5, %s3212_s19 }
 0x1a7   : > { %v1878_v4 = vpop.permute.xlu0 %1877 }
 0x1a8   : > { %v2201_v0 = vsel %vm2198_vm9, %v2168_v40, %v1878_v4  ;;  %v3885_v16 = vpop.permute.xlu1 %991  ;;  %v3928_v4 = vld [vmem:[#allocation2 + $0xb0] sm:$0xff]  ;;  %v3934_v40 = vld [vmem:[#allocation2 + $0xc1] sm:$0xff] }
 0x1a9   : > { %2928 = vmatmul.msk.f32.gmra.mxu1 %vm2244_vm10, %v2201_v0 }
 0x1ac   : > { %1005 = vrot.lane.b32.xlu2 %v3894_v26, %s3212_s19 }
 0x1ad   : > { %1261 = vrot.lane.b32.xlu0 %v3890_v11, %s3214_s21 }
 0x1ae   : > { %v1626_v33 = vpop.permute.xlu2 %1625  ;;  %1257 = vrot.lane.b32.xlu1 %v3900_v8, %s3214_s21 }
 0x1af   : > { %v1624_v23 = vpop.permute.xlu0 %1623 }
 0x1b0   : > { %v2136_v10 = vsel %vm2132_vm7, %v2103_v3, %v1624_v23  ;;  %v1752_v51 = vpop.permute.xlu1 %1751  ;;  %v3944_v23 = vld [vmem:[#allocation2 + $0xc9] sm:$0xff] }
 0x1b1   : > { %v2169_v35 = vsel %vm2165_vm8, %v2136_v10, %v1752_v51  ;;  %v3950_v3 = vld [vmem:[#allocation2 + $0xca] sm:$0xff] }
 0x1b2   : > { %v2202_v44 = vsel %vm2198_vm9, %v2169_v35, %v1880_v32 }
 0x1b3   : > { %2929 = vmatmul.msk.f32.gmra.mxu1 %vm2244_vm10, %v2202_v44  ;;  %v3958_v44 = vld [vmem:[#allocation2 + $0xe0] sm:$0xff] }
 0x1b4   : > { %1135 = vrot.lane.b32.xlu2 %v3912_v12, %s5085_s12 }
 0x1b5   : > { %1137 = vrot.lane.b32.xlu0 %v3908_v36, %s5085_s12 }
 0x1b6   : > { %v3922_v30 = vpop.permute.xlu2 %1123  ;;  %1133 = vrot.lane.b32.xlu1 %v3918_v42, %s5085_s12 }
 0x1b7   : > { %v3920_v58 = vpop.permute.xlu0 %1499 }
 0x1b8   : > { %v1498_v32 = vpop.permute.xlu1 %1497 }
 0x1b9   : > { %v2104_v34 = vsel %vm2099_vm6, %v2071_v18, %v1498_v32  ;;  %v1974_v32 = vsel %vm581_vm1, %v3585_v46, %v3715_v62 }
 0x1ba   : > { %v2137_v14 = vsel %vm2132_vm7, %v2104_v34, %v1626_v33  ;;  %v2007_v52 = vsel %vm2001_vm4, %v1974_v32, %v3777_v56  ;;  %v4022_v33 = vld [vmem:[#allocation2 + $0xf0] sm:$0xff] }
 0x1bb   : > { %v2040_v34 = vsel %vm2034_vm5, %v2007_v52, %v3853_v45 }
 0x1bc   : > { %1259 = vrot.lane.b32.xlu2 %v3928_v4, %s3214_s21  ;;  %v2072_v62 = vsel %vm339_vm0, %v2040_v34, %v3855_v48  ;;  %v4046_v48 = vld [vmem:[#allocation2 + $0xf2] sm:$0xff] }
 0x1bd   : > { %1013 = vrot.lane.b32.xlu0 %v3926_v38, %s3212_s19  ;;  %v2105_v56 = vsel %vm2099_vm6, %v2072_v62, %v3920_v58  ;;  %5098 = vst [vmem:[#allocation26_spill] sm:$0xff] %v4046_v48  ;;  %v4051_v58 = vld [vmem:[%s5053_s4] ss:$0 sm:$0xff] }
 0x1be   : > { %v3936_v9 = vpop.permute.xlu2 %1247  ;;  %1009 = vrot.lane.b32.xlu1 %v3934_v40, %s3212_s19 }
 0x1bf   : > { %v1754_v0 = vpop.permute.xlu0 %1753 }
 0x1c0   : > { %v3940_v2 = vpop.permute.xlu1 %1245  ;;  %v2170_v17 = vsel %vm2165_vm8, %v2137_v14, %v1754_v0 }
 0x1c4   : > { %1011 = vrot.lane.b32.xlu2 %v3944_v23, %s3212_s19 }
 0x1c5   : > { %1143 = vrot.lane.b32.xlu0 %v3942_v41, %s5085_s12 }
 0x1c6   : > { %v1756_v51 = vpop.permute.xlu2 %1755  ;;  %1139 = vrot.lane.b32.xlu1 %v3950_v3, %s5085_s12 }
 0x1c7   : > { %v3952_v10 = vpop.permute.xlu0 %995 }
 0x1c8   : > { %v3956_v35 = vpop.permute.xlu1 %1373 }
 0x1cc   : > { %1265 = vrot.lane.b32.xlu2 %v3960_v53, %s3214_s21 }
 0x1cd   : > { %1267 = vrot.lane.b32.xlu0 %v3958_v44, %s3214_s21 }
 0x1ce   : > { %v3971_v43 = vpop.permute.xlu2 %1501  ;;  %1263 = vrot.lane.b32.xlu1 %v3969_v22, %s3214_s21 }
 0x1cf   : > { %v1884_v49 = vpop.permute.xlu0 %1883 }
 0x1d0   : > { %v3978_v61 = vpop.permute.xlu1 %1121 }
 0x1d4   : > { %1141 = vrot.lane.b32.xlu2 %v3988_v20, %s5085_s12 }
 0x1d5   : > { %1019 = vrot.lane.b32.xlu0 %v3982_v59, %s3212_s19  ;;  %v4014_v59 = vld [vmem:[#allocation2 + $0xf1] sm:$0xff] }
 0x1d6   : > { %v3999_v50 = vpop.permute.xlu2 %1377  ;;  %1015 = vrot.lane.b32.xlu1 %v3995_v63, %s3212_s19 }
 0x1d7   : > { %v3997_v27 = vpop.permute.xlu0 %1375 }
 0x1d8   : > { %v1882_v18 = vpop.permute.xlu1 %1881 }
 0x1d9   : > { %v2203_v55 = vsel %vm2198_vm9, %v2170_v17, %v1882_v18  ;;  %v4035_v17 = vld [vmem:[#allocation2 + $0x10a] sm:$0xff] }
 0x1da   : > { %2930 = vmatmul.msk.f32.gmra.mxu1 %vm2244_vm10, %v2203_v55  ;;  %5096 = vst [vmem:[#allocation24_spill] sm:$0xff] %v4035_v17  ;;  %v4038_v55 = vld [vmem:[#allocation2 + $0xfa] sm:$0xff] }
 0x1db   : > { %5097 = vst [vmem:[#allocation25_spill] sm:$0xff] %v4038_v55 }
 0x1dc   : > { %1017 = vrot.lane.b32.xlu2 %v4014_v59, %s3212_s19 }
 0x1dd   : > { %1273 = vrot.lane.b32.xlu0 %v4006_v21, %s3214_s21 }
 0x1de   : > { %v4026_v46 = vpop.permute.xlu2 %999  ;;  %1269 = vrot.lane.b32.xlu1 %v4022_v33, %s3214_s21 }
 0x1df   : > { %v4024_v0 = vpop.permute.xlu0 %1249  ;;  %5095 = vst [vmem:[#allocation23_spill] sm:$0xff] %v4026_v46  ;;  %v4085_v46 = vld [vmem:[#allocation2 + $0x112] sm:$0xff] }
 0x1e0   : > { %v1628_v45 = vpop.permute.xlu1 %1627  ;;  %5102 = vst [vmem:[#allocation30_spill] sm:$0xff] %v4085_v46 }
 0x1e1   : > { %v2138_v14 = vsel %vm2132_vm7, %v2105_v56, %v1628_v45  ;;  %v712_v56 = vld [vmem:[#allocation2 + $0x121] sm:$0xff] }
 0x1e2   : > { %v2171_v18 = vsel %vm2165_vm8, %v2138_v14, %v1756_v51  ;;  %v4056_v14 = vld [vmem:[#allocation2 + $0xf8] sm:$0xff] }
 0x1e3   : > { %v2204_v32 = vsel %vm2198_vm9, %v2171_v18, %v1884_v49  ;;  %v4062_v18 = vld [vmem:[#allocation2 + $0x109] sm:$0xff] }
 0x1e4   : > { %1147 = vrot.lane.b32.xlu2 %v4038_v55, %s5085_s12  ;;  %2931 = vmatmul.msk.f32.gmra.mxu1 %vm2244_vm10, %v2204_v32  ;;  %5099 = vst [vmem:[#allocation27_spill] sm:$0xff] %v4062_v18  ;;  %v4075_v55 = vld [vmem:[#allocation2 + $0x111] sm:$0xff] }
 0x1e5   : > { %1149 = vrot.lane.b32.xlu0 %v4035_v17, %s5085_s12  ;;  %5101 = vst [vmem:[#allocation29_spill] sm:$0xff] %v4075_v55 }
 0x1e6   : > { %v1886_v52 = vpop.permute.xlu2 %1885  ;;  %1145 = vrot.lane.b32.xlu1 %v4046_v48, %s5085_s12 }
 0x1e7   : > { %v1630_v51 = vpop.permute.xlu0 %1629 }
 0x1e8   : > { %v2358_v49 = vpop.f32.mrf.mxu1  ;;  %v1504_v34 = vpop.permute.xlu1 %1503 }
 0x1e9   : > { %v2359_v62 = vadd.f32 %v4051_v58, %v2358_v49 }
 0x1eb   : > { %v2454_v45 = vmax.f32 %v2359_v62, 0.0  ;;  %v4070_v62 = vld [vmem:[#allocation2 + $0x12a] sm:$0xff] }
 0x1ec   : > { %1271 = vrot.lane.b32.xlu2 %v4056_v14, %s3214_s21 }
 0x1ed   : > { %1025 = vrot.lane.b32.xlu0 %v712_v56, %s3212_s19  ;;  %2958 = vmatmul.msk.f32.vlgmr.msra.gmra.mxu2 %vm581_vm1, %v2454_v45  ;;  %v1975_v56 = vsel %vm581_vm1, %v3603_v57, %v3786_v7 }
 0x1ee   : > { %v1632_v17 = vpop.permute.xlu2 %1631  ;;  %1021 = vrot.lane.b32.xlu1 %v4062_v18, %s3212_s19  ;;  %v2008_v45 = vsel %vm2001_vm4, %v1975_v56, %v3822_v28 }
 0x1ef   : > { %v4064_v32 = vpop.permute.xlu0 %1125  ;;  %v2041_v18 = vsel %vm2034_vm5, %v2008_v45, %v3940_v2  ;;  %v4099_v45 = vld [vmem:[#allocation2 + $0x128] sm:$0xff] }
 0x1f0   : > { %5100 = vst [vmem:[#allocation28_spill] sm:$0xff] %v4064_v32  ;;  %v4068_v49 = vpop.permute.xlu1 %997  ;;  %v2073_v32 = vsel %vm339_vm0, %v2041_v18, %v3956_v35  ;;  %v4101_v35 = vld [vmem:[#allocation2 + $0x120] sm:$0xff] }
 0x1f1   : > { %v2106_v28 = vsel %vm2099_vm6, %v2073_v32, %v3971_v43  ;;  %v4107_v43 = vld [vmem:[#allocation2 + $0x110] sm:$0xff] }
 0x1f2   : > { %v2139_v56 = vsel %vm2132_vm7, %v2106_v28, %v1630_v51 }
 0x1f4   : > { %1023 = vrot.lane.b32.xlu2 %v4075_v55, %s3212_s19 }
 0x1f5   : > { %1155 = vrot.lane.b32.xlu0 %v4070_v62, %s5085_s12 }
 0x1f6   : > { %v4089_v7 = vpop.permute.xlu2 %1253  ;;  %1151 = vrot.lane.b32.xlu1 %v4085_v46, %s5085_s12 }
 0x1f7   : > { %v1760_v57 = vpop.permute.xlu0 %1759 }
 0x1f8   : > { %v1758_v55 = vpop.permute.xlu1 %1757 }
 0x1f9   : > { %v2172_v48 = vsel %vm2165_vm8, %v2139_v56, %v1758_v55 }
 0x1fa   : > { %v2205_v2 = vsel %vm2198_vm9, %v2172_v48, %v1886_v52  ;;  %v4117_v48 = vld [vmem:[#allocation2 + $0x122] sm:$0xff] }
 0x1fb   : > { %2932 = vmatmul.msk.f32.gmra.mxu1 %vm2244_vm10, %v2205_v2  ;;  %5104 = vst [vmem:[#allocation32_spill] sm:$0xff] %v4117_v48  ;;  %v4123_v52 = vld [vmem:[#allocation2 + $0x129] sm:$0xff]  ;;  %v1976_v2 = vsel %vm581_vm1, %v3623_v6, %v3885_v16 }
 0x1fc   : > { %1277 = vrot.lane.b32.xlu2 %v4101_v35, %s3214_s21 }
 0x1fd   : > { %1279 = vrot.lane.b32.xlu0 %v4099_v45, %s3214_s21 }
 0x1fe   : > { %v4111_v18 = vpop.permute.xlu2 %1129  ;;  %1275 = vrot.lane.b32.xlu1 %v4107_v43, %s3214_s21 }
 0x1ff   : > { %v4109_v51 = vpop.permute.xlu0 %1001  ;;  %5103 = vst [vmem:[#allocation31_spill] sm:$0xff] %v4111_v18 }
 0x200   : > { %v4115_v55 = vpop.permute.xlu1 %1127 }
 0x204   : > { %1153 = vrot.lane.b32.xlu2 %v4117_v48, %s5085_s12  ;;  %v2009_v48 = vsel %vm2001_vm4, %v1976_v2, %v3834_v31 }
 0x205   : > { %1505 = vrot.lane.b32.xlu0 %v3779_v60, %s3217_s8 }
 0x206   : > { %v4127_v28 = vpop.permute.xlu2 %1005  ;;  %1027 = vrot.lane.b32.xlu1 %v4123_v52, %s3212_s19 }
 0x207   : > { %v4125_v32 = vpop.permute.xlu0 %1131  ;;  %5106 = vst [vmem:[#allocation34_spill] sm:$0xff] %v4127_v28  ;;  %v2361_v56 = vpop.f32.mrf.mxu1  ;;  %v4158_v28 = vld [vmem:[#allocation2 + $0x139] sm:$0xff] }
 0x208   : > { %5105 = vst [vmem:[#allocation33_spill] sm:$0xff] %v4125_v32  ;;  %v2362_v46 = vadd.f32 %v4051_v58, %v2361_v56  ;;  %v4135_v60 = vpop.permute.xlu1 %1251  ;;  %v2042_v32 = vsel %vm2034_vm5, %v2009_v48, %v3936_v9 }
 0x209   : > { %v2074_v6 = vsel %vm339_vm0, %v2042_v32, %v3997_v27  ;;  %v4165_v27 = vld [vmem:[#allocation2 + $0x13a] sm:$0xff] }
 0x20a   : > { %v2455_v18 = vmax.f32 %v2362_v46, 0.0  ;;  %v2107_v16 = vsel %vm2099_vm6, %v2074_v6, %v1504_v34 }
 0x20b   : > { %v2140_v31 = vsel %vm2132_vm7, %v2107_v16, %v1632_v17 }
 0x20c   : > { %1761 = vrot.lane.b32.xlu2 %v3811_v1, %s3218_s17  ;;  %2959 = vmatmul.msk.f32.gmra.mxu2 %vm581_vm1, %v2455_v18  ;;  %v2173_v9 = vsel %vm2165_vm8, %v2140_v31, %v1760_v57 }
 0x20d   : > { %1889 = vrot.lane.b32.xlu0 %v3868_v37, %s3219_s11 }
 0x20e   : > { %v4151_v56 = vpop.permute.xlu2 %1135  ;;  %1633 = vrot.lane.b32.xlu1 %v3845_v19, %s3216_s29 }
 0x20f   : > { %v4149_v46 = vpop.permute.xlu0 %1255 }
 0x210   : > { %v1888_v48 = vpop.permute.xlu1 %1887 }
 0x211   : > { %v2206_v2 = vsel %vm2198_vm9, %v2173_v9, %v1888_v48 }
 0x212   : > { %2933 = vmatmul.msk.f32.gmra.mxu1 %vm2244_vm10, %v2206_v2 }
 0x214   : > { %1029 = vrot.lane.b32.xlu2 %v4158_v28, %s3212_s19 }
 0x215   : > { %1635 = vrot.lane.b32.xlu0 %v3843_v39, %s3216_s29 }
 0x216   : > { %v4169_v17 = vpop.permute.xlu2 %1259  ;;  %1157 = vrot.lane.b32.xlu1 %v4165_v27, %s5085_s12 }
 0x217   : > { %v4167_v34 = vpop.permute.xlu0 %1007 }
 0x218   : > { %v4173_v57 = vpop.permute.xlu1 %1003 }
 0x21c   : > { %1507 = vrot.lane.b32.xlu2 %v3818_v24, %s3217_s8 }
 0x21d   : > { %1381 = vrot.lane.b32.xlu0 %v3811_v1, %s3215_s23 }
 0x21e   : > { %v4181_v32 = vpop.permute.xlu2 %1011  ;;  %1379 = vrot.lane.b32.xlu1 %v3791_v13, %s3215_s23 }
 0x21f   : > { %v4179_v18 = vpop.permute.xlu0 %1261  ;;  %5107 = vst [vmem:[#allocation35_spill] sm:$0xff] %v4181_v32 }
 0x220   : > { %v4185_v6 = vpop.permute.xlu1 %1257 }
 0x224   : > { %1891 = vrot.lane.b32.xlu2 %v3826_v29, %s3219_s11 }
 0x225   : > { %1765 = vrot.lane.b32.xlu0 %v3894_v26, %s3218_s17 }
 0x226   : > { %v2364_v16 = vpop.f32.mrf.mxu1  ;;  %v4194_v24 = vpop.permute.xlu2 %1265  ;;  %1763 = vrot.lane.b32.xlu1 %v3874_v5, %s3218_s17 }
 0x227   : > { %v2365_v1 = vadd.f32 %v4051_v58, %v2364_v16  ;;  %v4192_v31 = vpop.permute.xlu0 %1137  ;;  %5108 = vst [vmem:[#allocation36_spill] sm:$0xff] %v4194_v24 }
 0x228   : > { %v4198_v13 = vpop.permute.xlu1 %1133 }
 0x229   : > { %v2456_v9 = vmax.f32 %v2365_v1, 0.0 }
 0x22b   : > { %2960 = vmatmul.msk.f32.gmra.mxu2 %vm581_vm1, %v2456_v9 }
 0x22c   : > { %1637 = vrot.lane.b32.xlu2 %v3900_v8, %s3216_s29 }
 0x22d   : > { %1511 = vrot.lane.b32.xlu0 %v3826_v29, %s3217_s8 }
 0x22e   : > { %v4207_v2 = vpop.permute.xlu2 %1141  ;;  %1509 = vrot.lane.b32.xlu1 %v3868_v37, %s3217_s8 }
 0x22f   : > { %v4205_v48 = vpop.permute.xlu0 %1013  ;;  %5110 = vst [vmem:[#allocation38_spill] sm:$0xff] %v4207_v2 }
 0x230   : > { %5109 = vst [vmem:[#allocation37_spill] sm:$0xff] %v4205_v48  ;;  %v4211_v16 = vpop.permute.xlu1 %1009  ;;  %v2367_v1 = vpop.f32.mrf.mxu1 }
 0x231   : > { %v2368_v32 = vadd.f32 %v4051_v58, %v2367_v1 }
 0x233   : > { %v2457_v24 = vmax.f32 %v2368_v32, 0.0 }
 0x234   : > { %1383 = vrot.lane.b32.xlu2 %v3874_v5, %s3215_s23 }
 0x235   : > { %1895 = vrot.lane.b32.xlu0 %v3912_v12, %s3219_s11  ;;  %2961 = vmatmul.msk.f32.gmra.mxu2 %vm581_vm1, %v2457_v24 }
 0x236   : > { %v1018_v9 = vpop.permute.xlu2 %1017  ;;  %1893 = vrot.lane.b32.xlu1 %v3918_v42, %s3219_s11 }
 0x237   : > { %v4219_v29 = vpop.permute.xlu0 %1143 }
 0x238   : > { %5111 = vst [vmem:[#allocation39_spill] sm:$0xff] %v4219_v29  ;;  %v4223_v37 = vpop.permute.xlu1 %1139 }
 0x239   : > { %5112 = vst [vmem:[#allocation40_spill] sm:$0xff] %v4223_v37 }
 0x23c   : > { %1767 = vrot.lane.b32.xlu2 %v3863_v54, %s3218_s17 }
 0x23d   : > { %1641 = vrot.lane.b32.xlu0 %v3890_v11, %s3216_s29 }
 0x23e   : > { %v1148_v1 = vpop.permute.xlu2 %1147  ;;  %1639 = vrot.lane.b32.xlu1 %v3928_v4, %s3216_s29 }
 0x23f   : > { %v4229_v32 = vpop.permute.xlu0 %1267 }
 0x240   : > { %5113 = vst [vmem:[#allocation41_spill] sm:$0xff] %v4229_v32  ;;  %v4233_v5 = vpop.permute.xlu1 %1263 }
 0x244   : > { %1513 = vrot.lane.b32.xlu2 %v3918_v42, %s3217_s8 }
 0x245   : > { %1387 = vrot.lane.b32.xlu0 %v3863_v54, %s3215_s23 }
 0x246   : > { %v4239_v29 = vpop.permute.xlu2 %1271  ;;  %1385 = vrot.lane.b32.xlu1 %v3894_v26, %s3215_s23 }
 0x247   : > { %v1020_v24 = vpop.permute.xlu0 %1019  ;;  %5114 = vst [vmem:[#allocation42_spill] sm:$0xff] %v4239_v29  ;;  %v1989_v29 = vsel %vm581_vm1, %v4022_v33, %v1018_v9 }
 0x248   : > { %v1990_v11 = vsel %vm581_vm1, %v4056_v14, %v1020_v24  ;;  %v4245_v2 = vpop.permute.xlu1 %1015 }
 0x249   : > { %5115 = vst [vmem:[#allocation43_spill] sm:$0xff] %v4245_v2  ;;  %v2023_v48 = vsel %vm2001_vm4, %v1990_v11, %v1148_v1 }
 0x24c   : > { %1897 = vrot.lane.b32.xlu2 %v3908_v36, %s3219_s11 }
 0x24d   : > { %1771 = vrot.lane.b32.xlu0 %v3944_v23, %s3218_s17 }
 0x24e   : > { %v1024_v42 = vpop.permute.xlu2 %1023  ;;  %1769 = vrot.lane.b32.xlu1 %v3934_v40, %s3218_s17 }
 0x24f   : > { %v1274_v54 = vpop.permute.xlu0 %1273 }
 0x250   : > { %v4254_v26 = vpop.permute.xlu1 %1269 }
 0x251   : > { %5116 = vst [vmem:[#allocation44_spill] sm:$0xff] %v4254_v26 }
 0x254   : > { %1643 = vrot.lane.b32.xlu2 %v3969_v22, %s3216_s29  ;;  %v329_v22 = vld [vmem:[%s3353_s16 + $0xf0] sm:$0xff] }
 0x255   : > { %1517 = vrot.lane.b32.xlu0 %v3908_v36, %s3217_s8  ;;  %2924 = vmatmul.msk.f32.gmra.mxu3 %vm339_vm0, %v329_v22 }
 0x256   : > { %v1278_v24 = vpop.permute.xlu2 %1277  ;;  %1515 = vrot.lane.b32.xlu1 %v3912_v12, %s3217_s8 }
 0x257   : > { %v1150_v1 = vpop.permute.xlu0 %1149  ;;  %v2370_v11 = vpop.f32.mrf.mxu1 }
 0x258   : > { %v2371_v2 = vadd.f32 %v4051_v58, %v2370_v11  ;;  %v1146_v32 = vpop.permute.xlu1 %1145 }
 0x259   : > { %v2022_v26 = vsel %vm2001_vm4, %v1989_v29, %v1146_v32 }
 0x25a   : > { %v2458_v37 = vmax.f32 %v2371_v2, 0.0  ;;  %v4267_v36 = vsel %vm2034_vm5, %v2022_v26, %v1274_v54  ;;  %v330_v26 = vld [vmem:[%s3353_s16 + $0xf8] sm:$0xff] }
 0x25c   : > { %1389 = vrot.lane.b32.xlu2 %v3934_v40, %s3215_s23  ;;  %2962 = vmatmul.msk.f32.gmra.mxu2 %vm581_vm1, %v2458_v37 }
 0x25d   : > { %1901 = vrot.lane.b32.xlu0 %v3988_v20, %s3219_s11  ;;  %2925 = vmatmul.msk.f32.gmra.mxu3 %vm339_vm0, %v330_v26 }
 0x25e   : > { %v1154_v9 = vpop.permute.xlu2 %1153  ;;  %1899 = vrot.lane.b32.xlu1 %v3950_v3, %s3219_s11 }
 0x25f   : > { %v1026_v12 = vpop.permute.xlu0 %1025 }
 0x260   : > { %v1993_v2 = vsel %vm581_vm1, %v4101_v35, %v1026_v12  ;;  %v1022_v32 = vpop.permute.xlu1 %1021 }
 0x261   : > { %v4281_v29 = vsel %vm2001_vm4, %v1993_v2, %v1154_v9  ;;  %v1991_v54 = vsel %vm581_vm1, %v4006_v21, %v1022_v32  ;;  %v2373_v37 = vpop.f32.mrf.mxu1  ;;  %v4309_v32 = vld [vmem:[%s5055_s6] ss:$0 sm:$0xff] }
 0x262   : > { %v2024_v40 = vsel %vm2001_vm4, %v1991_v54, %v1150_v1  ;;  %v2374_v11 = vadd.f32 %v4051_v58, %v2373_v37  ;;  %v1992_v1 = vsel %vm581_vm1, %v4107_v43, %v1024_v42 }
 0x263   : > { %v4289_v22 = vsel %vm2034_vm5, %v2024_v40, %v1278_v24 }
 0x264   : > { %1773 = vrot.lane.b32.xlu2 %v3926_v38, %s3218_s17  ;;  %v2459_v12 = vmax.f32 %v2374_v11, 0.0  ;;  %v3072_v11 = vld [vmem:[%s3353_s16] sm:$0xff] }
 0x265   : > { %1407 = vrot.lane.b32.xlu0 %v4123_v52, %s3215_s23 }
 0x266   : > { %v1762_v2 = vpop.permute.xlu2 %1761  ;;  %1645 = vrot.lane.b32.xlu1 %v3960_v53, %s3216_s29  ;;  %2963 = vmatmul.msk.f32.gmra.mxu2 %vm581_vm1, %v2459_v12 }
 0x267   : > { %v1156_v9 = vpop.permute.xlu0 %1155 }
 0x268   : > { %v1152_v24 = vpop.permute.xlu1 %1151 }
 0x269   : > { %v2025_v52 = vsel %vm2001_vm4, %v1992_v1, %v1152_v24  ;;  %v4321_v1 = vld [vmem:[#allocation2 + $0x141] sm:$0xff] }
 0x26c   : > { %1519 = vrot.lane.b32.xlu2 %v3950_v3, %s3217_s8 }
 0x26d   : > { %1775 = vrot.lane.b32.xlu0 %v3995_v63, %s3218_s17 }
 0x26e   : > { %v1030_v54 = vpop.permute.xlu2 %1029  ;;  %1391 = vrot.lane.b32.xlu1 %v3944_v23, %s3215_s23 }
 0x26f   : > { %v1280_v53 = vpop.permute.xlu0 %1279 }
 0x270   : > { %v4314_v42 = vsel %vm2034_vm5, %v2025_v52, %v1280_v53  ;;  %v2604_v40 = vpop.f32.mrf.mxu2  ;;  %v1276_v37 = vpop.permute.xlu1 %1275 }
 0x271   : > { %v2605_v26 = vadd.f32 %v4309_v32, %v2604_v40  ;;  %v4318_v3 = vsel %vm2034_vm5, %v2023_v48, %v1276_v37 }
 0x273   : > { %v2700_v12 = vadd.f32 %v3072_v11, %v2605_v26  ;;  %v4346_v11 = vld [vmem:[#allocation2 + $0x138] sm:$0xff] }
 0x274   : > { %1535 = vrot.lane.b32.xlu2 %v4070_v62, %s3217_s8  ;;  %v1977_v62 = vsel %vm581_vm1, %v3698_v47, %v3879_v15  ;;  %v4355_v47 = vld [vmem:[#allocation2 + $0x140] sm:$0xff] }
 0x275   : > { %1791 = vrot.lane.b32.xlu0 %v4321_v1, %s3218_s17  ;;  %v2732_v23 = vmax.f32 %v2700_v12, 0.0 }
 0x276   : > { %v1508_v52 = vpop.permute.xlu2 %1507  ;;  %1647 = vrot.lane.b32.xlu1 %v3958_v44, %s3216_s29  ;;  %v2010_v44 = vsel %vm2001_vm4, %v1977_v62, %v3978_v61 }
 0x277   : > { %v1506_v24 = vpop.permute.xlu0 %1505  ;;  %2764 = vst.msk [vmem:[%s4331_s20] sm:$0xff] %vm339_vm0, %v2732_v23  ;;  %v2043_v23 = vsel %vm2034_vm5, %v2010_v44, %v4024_v0 }
 0x278   : > { %v1028_v48 = vpop.permute.xlu1 %1027  ;;  %v2376_v53 = vpop.f32.mrf.mxu1  ;;  %v2075_v61 = vsel %vm339_vm0, %v2043_v23, %v3999_v50 }
 0x279   : > { %v1994_v40 = vsel %vm581_vm1, %v4099_v45, %v1028_v48  ;;  %v2377_v37 = vadd.f32 %v4051_v58, %v2376_v53  ;;  %v2108_v0 = vsel %vm2099_vm6, %v2075_v61, %v1506_v24  ;;  %v1995_v24 = vsel %vm581_vm1, %v4346_v11, %v1030_v54 }
 0x27a   : > { %v4342_v26 = vsel %vm2001_vm4, %v1994_v40, %v1156_v9 }
 0x27b   : > { %v2460_v12 = vmax.f32 %v2377_v37, 0.0  ;;  %v936_v37 = vld [vmem:[#allocation2 + $0x142] sm:$0xff] }
 0x27c   : > { %1903 = vrot.lane.b32.xlu2 %v3942_v41, %s3219_s11 }
 0x27d   : > { %1281 = vrot.lane.b32.xlu0 %v4346_v11, %s3214_s21  ;;  %2964 = vmatmul.msk.f32.gmra.mxu2 %vm581_vm1, %v2460_v12  ;;  %v4376_v12 = vld [vmem:[#allocation2 + $0x150] sm:$0xff] }
 0x27e   : > { %v1892_v45 = vpop.permute.xlu2 %1891  ;;  %1663 = vrot.lane.b32.xlu1 %v4355_v47, %s3216_s29 }
 0x27f   : > { %v1890_v15 = vpop.permute.xlu0 %1889 }
 0x280   : > { %v1634_v9 = vpop.permute.xlu1 %1633 }
 0x281   : > { %v2141_v48 = vsel %vm2132_vm7, %v2108_v0, %v1634_v9 }
 0x282   : > { %v2174_v53 = vsel %vm2165_vm8, %v2141_v48, %v1762_v2 }
 0x283   : > { %v2207_v40 = vsel %vm2198_vm9, %v2174_v53, %v1890_v15  ;;  %v3073_v53 = vld [vmem:[%s3353_s16 + $0x8] sm:$0xff] }
 0x284   : > { %1393 = vrot.lane.b32.xlu2 %v3926_v38, %s3215_s23  ;;  %2934 = vmatmul.msk.f32.gmra.mxu1 %vm2244_vm10, %v2207_v40  ;;  %v1978_v38 = vsel %vm581_vm1, %v3737_v25, %v3952_v10 }
 0x285   : > { %1649 = vrot.lane.b32.xlu0 %v4022_v33, %s3216_s29  ;;  %v2011_v15 = vsel %vm2001_vm4, %v1978_v38, %v3922_v30 }
 0x286   : > { %v1638_v50 = vpop.permute.xlu2 %1637  ;;  %1919 = vrot.lane.b32.xlu1 %v936_v37, %s3219_s11 }
 0x287   : > { %v1636_v62 = vpop.permute.xlu0 %1635 }
 0x288   : > { %v1158_v44 = vpop.permute.xlu1 %1157 }
 0x289   : > { %v4374_v2 = vsel %vm2001_vm4, %v1995_v24, %v1158_v44 }
 0x28c   : > { %1409 = vrot.lane.b32.xlu2 %v4158_v28, %s3215_s23  ;;  %v2044_v28 = vsel %vm2034_vm5, %v2011_v15, %v4135_v60 }
 0x28d   : > { %1665 = vrot.lane.b32.xlu0 %v4376_v12, %s3216_s29 }
 0x28e   : > { %v1384_v23 = vpop.permute.xlu2 %1383  ;;  %1521 = vrot.lane.b32.xlu1 %v3988_v20, %s3217_s8  ;;  %v4395_v20 = vld [vmem:[#allocation2 + $0x152] sm:$0xff] }
 0x28f   : > { %v1382_v33 = vpop.permute.xlu0 %1381  ;;  %v2379_v54 = vpop.f32.mrf.mxu1 }
 0x290   : > { %v2380_v61 = vadd.f32 %v4051_v58, %v2379_v54  ;;  %v2607_v0 = vpop.f32.mrf.mxu2  ;;  %v1380_v9 = vpop.permute.xlu1 %1379 }
 0x291   : > { %v2608_v48 = vadd.f32 %v4309_v32, %v2607_v0  ;;  %v2076_v10 = vsel %vm339_vm0, %v2044_v28, %v1380_v9  ;;  %v905_v0 = vld [vmem:[#allocation2 + $0x151] sm:$0xff] }
 0x292   : > { %v2461_v25 = vmax.f32 %v2380_v61, 0.0  ;;  %v2109_v24 = vsel %vm2099_vm6, %v2076_v10, %v1508_v52  ;;  %v5118_v52 = vld [vmem:[#allocation15_spill] sm:$0xff] }
 0x293   : > { %v2701_v40 = vadd.f32 %v3073_v53, %v2608_v48  ;;  %v2142_v38 = vsel %vm2132_vm7, %v2109_v24, %v1636_v62  ;;  %v1979_v9 = vsel %vm581_vm1, %v5118_v52, %v4068_v49  ;;  %v5119_v62 = vld [vmem:[#allocation26_spill] sm:$0xff]  ;;  %v5120_v48 = vld [vmem:[#allocation28_spill] sm:$0xff] }
 0x294   : > { %1777 = vrot.lane.b32.xlu2 %v4014_v59, %s3218_s17  ;;  %2965 = vmatmul.msk.f32.gmra.mxu2 %vm581_vm1, %v2461_v25 }
 0x295   : > { %1921 = vrot.lane.b32.xlu0 %v4395_v20, %s3219_s11  ;;  %v2733_v30 = vmax.f32 %v2701_v40, 0.0 }
 0x296   : > { %v1768_v44 = vpop.permute.xlu2 %1767  ;;  %1537 = vrot.lane.b32.xlu1 %v4165_v27, %s3217_s8 }
 0x297   : > { %v1766_v60 = vpop.permute.xlu0 %1765  ;;  %2765 = vst.msk [vmem:[%s4331_s20 + $0x8] sm:$0xff] %vm339_vm0, %v2733_v30 }
 0x298   : > { %v1764_v54 = vpop.permute.xlu1 %1763 }
 0x299   : > { %v2175_v15 = vsel %vm2165_vm8, %v2142_v38, %v1764_v54  ;;  %v5121_v38 = vld [vmem:[#allocation23_spill] sm:$0xff] }
 0x29a   : > { %v2208_v61 = vsel %vm2198_vm9, %v2175_v15, %v1892_v45  ;;  %v2012_v45 = vsel %vm2001_vm4, %v1979_v9, %v5120_v48  ;;  %v5123_v15 = vld [vmem:[#allocation25_spill] sm:$0xff] }
 0x29b   : > { %2935 = vmatmul.msk.f32.gmra.mxu1 %vm2244_vm10, %v2208_v61  ;;  %v2045_v25 = vsel %vm2034_vm5, %v2012_v45, %v4089_v7 }
 0x29c   : > { %1793 = vrot.lane.b32.xlu2 %v905_v0, %s3218_s17  ;;  %v2077_v53 = vsel %vm339_vm0, %v2045_v25, %v1382_v33 }
 0x29d   : > { %1523 = vrot.lane.b32.xlu0 %v3942_v41, %s3217_s8 }
 0x29e   : > { %v1514_v28 = vpop.permute.xlu2 %1513  ;;  %1905 = vrot.lane.b32.xlu1 %v5119_v62, %s3219_s11 }
 0x29f   : > { %v1512_v27 = vpop.permute.xlu0 %1511 }
 0x2a0   : > { %v1510_v10 = vpop.permute.xlu1 %1509 }
 0x2a1   : > { %v2110_v49 = vsel %vm2099_vm6, %v2077_v53, %v1510_v10 }
 0x2a2   : > { %v2143_v41 = vsel %vm2132_vm7, %v2110_v49, %v1638_v50 }
 0x2a3   : > { %v2176_v7 = vsel %vm2165_vm8, %v2143_v41, %v1766_v60 }
 0x2a4   : > { %1283 = vrot.lane.b32.xlu2 %v4355_v47, %s3214_s21 }
 0x2a5   : > { %1539 = vrot.lane.b32.xlu0 %v936_v37, %s3217_s8  ;;  %v5122_v37 = vld [vmem:[#allocation20_spill] sm:$0xff] }
 0x2a6   : > { %v1898_v30 = vpop.permute.xlu2 %1897  ;;  %1395 = vrot.lane.b32.xlu1 %v3995_v63, %s3215_s23  ;;  %v1980_v54 = vsel %vm581_vm1, %v5122_v37, %v5121_v38 }
 0x2a7   : > { %v1896_v40 = vpop.permute.xlu0 %1895  ;;  %v2013_v63 = vsel %vm2001_vm4, %v1980_v54, %v4115_v55  ;;  %v4472_v54 = vld [vmem:[#allocation2 + $0x15a] sm:$0xff] }
 0x2a8   : > { %v1894_v24 = vpop.permute.xlu1 %1893  ;;  %v2046_v60 = vsel %vm2034_vm5, %v2013_v63, %v4149_v46  ;;  %v874_v46 = vld [vmem:[#allocation2 + $0x158] sm:$0xff] }
 0x2a9   : > { %v2209_v33 = vsel %vm2198_vm9, %v2176_v7, %v1894_v24  ;;  %v2078_v48 = vsel %vm339_vm0, %v2046_v60, %v1384_v23  ;;  %v5125_v24 = vld [vmem:[#allocation31_spill] sm:$0xff] }
 0x2aa   : > { %2936 = vmatmul.msk.f32.gmra.mxu1 %vm2244_vm10, %v2209_v33  ;;  %v2111_v45 = vsel %vm2099_vm6, %v2078_v48, %v1512_v27  ;;  %v4478_v60 = vld [vmem:[#allocation2 + $0x159] sm:$0xff] }
 0x2ac   : > { %1651 = vrot.lane.b32.xlu2 %v4056_v14, %s3216_s29  ;;  %v3074_v14 = vld [vmem:[%s3353_s16 + $0x10] sm:$0xff] }
 0x2ad   : > { %1907 = vrot.lane.b32.xlu0 %v5123_v15, %s3219_s11 }
 0x2ae   : > { %v2610_v50 = vpop.f32.mrf.mxu2  ;;  %v1644_v9 = vpop.permute.xlu2 %1643  ;;  %1411 = vrot.lane.b32.xlu1 %v4321_v1, %s3215_s23  ;;  %v1981_v1 = vsel %vm581_vm1, %v3845_v19, %v4109_v51  ;;  %v3075_v51 = vld [vmem:[%s3353_s16 + $0x18] sm:$0xff] }
 0x2af   : > { %v2611_v61 = vadd.f32 %v4309_v32, %v2610_v50  ;;  %v1642_v52 = vpop.permute.xlu0 %1641 }
 0x2b0   : > { %v1640_v10 = vpop.permute.xlu1 %1639 }
 0x2b1   : > { %v2702_v25 = vadd.f32 %v3074_v14, %v2611_v61  ;;  %v2144_v55 = vsel %vm2132_vm7, %v2111_v45, %v1640_v10  ;;  %v1982_v14 = vsel %vm581_vm1, %v3843_v39, %v4173_v57  ;;  %v5127_v10 = vld [vmem:[#allocation33_spill] sm:$0xff] }
 0x2b2   : > { %v2177_v49 = vsel %vm2165_vm8, %v2144_v55, %v1768_v44  ;;  %v5124_v44 = vld [vmem:[#allocation22_spill] sm:$0xff] }
 0x2b3   : > { %v2734_v53 = vmax.f32 %v2702_v25, 0.0  ;;  %v2210_v41 = vsel %vm2198_vm9, %v2177_v49, %v1896_v40  ;;  %v2014_v40 = vsel %vm2001_vm4, %v1981_v1, %v5125_v24  ;;  %v5126_v25 = vld [vmem:[#allocation27_spill] sm:$0xff] }
 0x2b4   : > { %1667 = vrot.lane.b32.xlu2 %v874_v46, %s3216_s29  ;;  %2937 = vmatmul.msk.f32.gmra.mxu1 %vm2244_vm10, %v2210_v41  ;;  %v4503_v41 = vld [vmem:[#allocation2 + $0x169] sm:$0xff] }
 0x2b5   : > { %2766 = vst.msk [vmem:[%s4331_s20 + $0x10] sm:$0xff] %vm339_vm0, %v2734_v53  ;;  %1397 = vrot.lane.b32.xlu0 %v4014_v59, %s3215_s23  ;;  %v2047_v59 = vsel %vm2034_vm5, %v2014_v40, %v4185_v6  ;;  %v5128_v40 = vld [vmem:[#allocation34_spill] sm:$0xff] }
 0x2b6   : > { %v1390_v27 = vpop.permute.xlu2 %1389  ;;  %1779 = vrot.lane.b32.xlu1 %v5124_v44, %s3218_s17 }
 0x2b7   : > { %v1388_v23 = vpop.permute.xlu0 %1387 }
 0x2b8   : > { %v1386_v7 = vpop.permute.xlu1 %1385  ;;  %v2613_v33 = vpop.f32.mrf.mxu2 }
 0x2b9   : > { %v2614_v38 = vadd.f32 %v4309_v32, %v2613_v33  ;;  %v2079_v19 = vsel %vm339_vm0, %v2047_v59, %v1386_v7  ;;  %v1983_v7 = vsel %vm581_vm1, %v3900_v8, %v5128_v40  ;;  %v3078_v40 = vld [vmem:[%s3353_s16 + $0x28] sm:$0xff] }
 0x2ba   : > { %v2112_v63 = vsel %vm2099_vm6, %v2079_v19, %v1514_v28 }
 0x2bb   : > { %v2703_v37 = vadd.f32 %v3075_v51, %v2614_v38  ;;  %v2145_v48 = vsel %vm2132_vm7, %v2112_v63, %v1642_v52  ;;  %v2015_v52 = vsel %vm2001_vm4, %v1982_v14, %v5127_v10  ;;  %v3077_v14 = vld [vmem:[%s3353_s16 + $0x20] sm:$0xff] }
 0x2bc   : > { %1923 = vrot.lane.b32.xlu2 %v4472_v54, %s3219_s11  ;;  %v2048_v39 = vsel %vm2034_vm5, %v2015_v52, %v4169_v17  ;;  %v4554_v10 = vld [vmem:[#allocation2 + $0x170] sm:$0xff] }
 0x2bd   : > { %1413 = vrot.lane.b32.xlu0 %v905_v0, %s3215_s23  ;;  %v2735_v50 = vmax.f32 %v2703_v37, 0.0 }
 0x2be   : > { %v1774_v6 = vpop.permute.xlu2 %1773  ;;  %1795 = vrot.lane.b32.xlu1 %v4478_v60, %s3218_s17 }
 0x2bf   : > { %v1772_v61 = vpop.permute.xlu0 %1771  ;;  %2767 = vst.msk [vmem:[%s4331_s20 + $0x18] sm:$0xff] %vm339_vm0, %v2735_v50  ;;  %v1984_v50 = vsel %vm581_vm1, %v3928_v4, %v4167_v34 }
 0x2c0   : > { %v1770_v45 = vpop.permute.xlu1 %1769 }
 0x2c1   : > { %v2178_v0 = vsel %vm2165_vm8, %v2145_v48, %v1770_v45 }
 0x2c2   : > { %v2211_v28 = vsel %vm2198_vm9, %v2178_v0, %v1898_v30  ;;  %v2080_v30 = vsel %vm339_vm0, %v2048_v39, %v1388_v23  ;;  %v2017_v0 = vsel %vm2001_vm4, %v1984_v50, %v4151_v56 }
 0x2c3   : > { %2938 = vmatmul.msk.f32.gmra.mxu1 %vm2244_vm10, %v2211_v28  ;;  %v2050_v4 = vsel %vm2034_vm5, %v2017_v0, %v4233_v5 }
 0x2c4   : > { %1525 = vrot.lane.b32.xlu2 %v5119_v62, %s3217_s8 }
 0x2c5   : > { %1781 = vrot.lane.b32.xlu0 %v5126_v25, %s3218_s17 }
 0x2c6   : > { %v1520_v53 = vpop.permute.xlu2 %1519  ;;  %1285 = vrot.lane.b32.xlu1 %v4376_v12, %s3214_s21 }
 0x2c7   : > { %v1518_v55 = vpop.permute.xlu0 %1517 }
 0x2c8   : > { %v1516_v57 = vpop.permute.xlu1 %1515 }
 0x2c9   : > { %v2113_v49 = vsel %vm2099_vm6, %v2080_v30, %v1516_v57 }
 0x2ca   : > { %v2146_v62 = vsel %vm2132_vm7, %v2113_v49, %v1644_v9  ;;  %v5129_v9 = vld [vmem:[#allocation24_spill] sm:$0xff] }
 0x2cb   : > { %v2179_v23 = vsel %vm2165_vm8, %v2146_v62, %v1772_v61 }
 0x2cc   : > { %1541 = vrot.lane.b32.xlu2 %v4395_v20, %s3217_s8  ;;  %v2016_v20 = vsel %vm2001_vm4, %v1983_v7, %v4198_v13 }
 0x2cd   : > { %1797 = vrot.lane.b32.xlu0 %v4503_v41, %s3218_s17  ;;  %v2049_v33 = vsel %vm2034_vm5, %v2016_v20, %v4179_v18  ;;  %v939_v18 = vld [vmem:[#allocation2 + $0x16a] sm:$0xff] }
 0x2ce   : > { %v4510_v12 = vpop.permute.xlu2 %1535  ;;  %1653 = vrot.lane.b32.xlu1 %v4006_v21, %s3216_s29  ;;  %v4525_v21 = vld [vmem:[#allocation2 + $0x168] sm:$0xff]  ;;  %v2081_v8 = vsel %vm339_vm0, %v2049_v33, %v1390_v27 }
 0x2cf   : > { %v1902_v1 = vpop.permute.xlu0 %1901  ;;  %v2114_v19 = vsel %vm2099_vm6, %v2081_v8, %v1518_v55 }
 0x2d0   : > { %v1900_v17 = vpop.permute.xlu1 %1899 }
 0x2d1   : > { %v2212_v24 = vsel %vm2198_vm9, %v2179_v23, %v1900_v17  ;;  %v4574_v23 = vld [vmem:[#allocation2 + $0x172] sm:$0xff] }
 0x2d2   : > { %2939 = vmatmul.msk.f32.gmra.mxu1 %vm2244_vm10, %v2212_v24 }
 0x2d4   : > { %1909 = vrot.lane.b32.xlu2 %v5129_v9, %s3219_s11 }
 0x2d5   : > { %1287 = vrot.lane.b32.xlu0 %v874_v46, %s3214_s21 }
 0x2d6   : > { %v1904_v38 = vpop.permute.xlu2 %1903  ;;  %1669 = vrot.lane.b32.xlu1 %v4525_v21, %s3216_s29 }
 0x2d7   : > { %v1408_v59 = vpop.permute.xlu0 %1407 }
 0x2d8   : > { %v1646_v13 = vpop.permute.xlu1 %1645 }
 0x2d9   : > { %v2147_v46 = vsel %vm2132_vm7, %v2114_v19, %v1646_v13  ;;  %v2090_v19 = vsel %vm339_vm0, %v4314_v42, %v1408_v59  ;;  %v908_v13 = vld [vmem:[#allocation2 + $0x171] sm:$0xff] }
 0x2da   : > { %v2180_v51 = vsel %vm2165_vm8, %v2147_v46, %v1774_v6  ;;  %v2123_v46 = vsel %vm2099_vm6, %v2090_v19, %v4510_v12 }
 0x2db   : > { %v2213_v37 = vsel %vm2198_vm9, %v2180_v51, %v1902_v1 }
 0x2dc   : > { %1399 = vrot.lane.b32.xlu2 %v5124_v44, %s3215_s23  ;;  %2940 = vmatmul.msk.f32.gmra.mxu1 %vm2244_vm10, %v2213_v37  ;;  %v3076_v44 = vld [vmem:[%s5051_s2] ss:$0 sm:$0xff] }
 0x2dd   : > { %1655 = vrot.lane.b32.xlu0 %v4107_v43, %s3216_s29  ;;  %v543_v43 = vpop.f32.mrf.mxu3 }
 0x2de   : > { %v4541_v63 = vpop.permute.xlu2 %1393  ;;  %1925 = vrot.lane.b32.xlu1 %v939_v18, %s3219_s11  ;;  %v544_v45 = vadd.f32 %v3076_v44, %v543_v43  ;;  %v3079_v43 = vld [vmem:[#allocation2 + $0xc0] sm:$0xff] }
 0x2df   : > { %v1776_v27 = vpop.permute.xlu0 %1775  ;;  %v2616_v61 = vpop.f32.mrf.mxu2 }
 0x2e0   : > { %v1392_v6 = vpop.permute.xlu1 %1391  ;;  %v2617_v48 = vadd.f32 %v4309_v32, %v2616_v61  ;;  %v579_v34 = vmax.f32 %v544_v45, 0.0 }
 0x2e1   : > { %v2082_v55 = vsel %vm339_vm0, %v2050_v4, %v1392_v6 }
 0x2e2   : > { %v2704_v28 = vadd.f32 %v3077_v14, %v2617_v48  ;;  %654 = vst.msk [vmem:[#allocation2 + $0x181] sm:$0xff] %vm581_vm1, %v579_v34  ;;  %v2115_v56 = vsel %vm2099_vm6, %v2082_v55, %v1520_v53  ;;  %v5130_v53 = vld [vmem:[#allocation29_spill] sm:$0xff]  ;;  %v5132_v14 = vld [vmem:[#allocation32_spill] sm:$0xff] }
 0x2e3   : > { %v5133_v55 = vld [vmem:[#allocation36_spill] sm:$0xff] }
 0x2e4   : > { %1415 = vrot.lane.b32.xlu2 %v4478_v60, %s3215_s23  ;;  %v2736_v52 = vmax.f32 %v2704_v28, 0.0 }
 0x2e5   : > { %1671 = vrot.lane.b32.xlu0 %v4554_v10, %s3216_s29  ;;  %v546_v30 = vpop.f32.mrf.mxu3 }
 0x2e6   : > { %v4563_v57 = vpop.permute.xlu2 %1409  ;;  %1527 = vrot.lane.b32.xlu1 %v5123_v15, %s3217_s8  ;;  %2768 = vst.msk [vmem:[%s4331_s20 + $0x20] sm:$0xff] %vm339_vm0, %v2736_v52  ;;  %v547_v1 = vadd.f32 %v3076_v44, %v546_v30  ;;  %v1985_v44 = vsel %vm581_vm1, %v3079_v43, %v4211_v16  ;;  %v805_v30 = vld [vmem:[#allocation2 + $0x111] sm:$0xff] }
 0x2e7   : > { %v1792_v39 = vpop.permute.xlu0 %1791 }
 0x2e8   : > { %v1648_v5 = vpop.permute.xlu1 %1647  ;;  %v580_v24 = vmax.f32 %v547_v1, 0.0 }
 0x2e9   : > { %v2148_v60 = vsel %vm2132_vm7, %v2115_v56, %v1648_v5  ;;  %v2619_v49 = vpop.f32.mrf.mxu2  ;;  %v4637_v5 = vld [vmem:[#allocation2 + $0x180] sm:$0xff] }
 0x2ea   : > { %v2181_v62 = vsel %vm2165_vm8, %v2148_v60, %v1776_v27  ;;  %v2620_v17 = vadd.f32 %v4309_v32, %v2619_v49  ;;  %655 = vst.msk [vmem:[#allocation2 + $0x189] sm:$0xff] %vm581_vm1, %v580_v24  ;;  %v5131_v27 = vld [vmem:[#allocation30_spill] sm:$0xff] }
 0x2eb   : > { %v2214_v15 = vsel %vm2198_vm9, %v2181_v62, %v1904_v38  ;;  %v4648_v62 = vld [vmem:[#allocation2 + $0x121] sm:$0xff] }
 0x2ec   : > { %1783 = vrot.lane.b32.xlu2 %v5130_v53, %s3218_s17  ;;  %v2705_v7 = vadd.f32 %v3078_v40, %v2620_v17  ;;  %2941 = vmatmul.msk.f32.gmra.mxu1 %vm2244_vm10, %v2214_v15 }
 0x2ed   : > { %1927 = vrot.lane.b32.xlu0 %v4574_v23, %s3219_s11 }
 0x2ee   : > { %v4583_v33 = vpop.permute.xlu2 %1777  ;;  %1543 = vrot.lane.b32.xlu1 %v4472_v54, %s3217_s8  ;;  %v2737_v38 = vmax.f32 %v2705_v7, 0.0  ;;  %v4660_v7 = vld [vmem:[#allocation2 + $0x181] sm:$0xff] }
 0x2ef   : > { %v1282_v20 = vpop.permute.xlu0 %1281 }
 0x2f0   : > { %v1664_v8 = vpop.permute.xlu1 %1663  ;;  %2769 = vst.msk [vmem:[%s4331_s20 + $0x28] sm:$0xff] %vm339_vm0, %v2737_v38  ;;  %v2059_v28 = vsel %vm2034_vm5, %v4281_v29, %v1282_v20 }
 0x2f1   : > { %v2156_v54 = vsel %vm2132_vm7, %v2123_v46, %v1664_v8  ;;  %v4657_v40 = vld [vmem:[#allocation2 + $0x182] sm:$0xff] }
 0x2f2   : > { %v2189_v42 = vsel %vm2165_vm8, %v2156_v54, %v1792_v39 }
 0x2f4   : > { %1799 = vrot.lane.b32.xlu2 %v908_v13, %s3218_s17 }
 0x2f5   : > { %1529 = vrot.lane.b32.xlu0 %v5129_v9, %s3217_s8 }
 0x2f6   : > { %v1794_v37 = vpop.permute.xlu2 %1793  ;;  %1911 = vrot.lane.b32.xlu1 %v5131_v27, %s3219_s11  ;;  %v902_v27 = vld [vmem:[#allocation2 + $0x129] sm:$0xff] }
 0x2f7   : > { %v1650_v51 = vpop.permute.xlu0 %1649 }
 0x2f8   : > { %v1920_v59 = vpop.permute.xlu1 %1919 }
 0x2f9   : > { %v2222_v50 = vsel %vm2198_vm9, %v2189_v42, %v1920_v59 }
 0x2fa   : > { %2949 = vmatmul.msk.f32.vlgmr.msrb.gmra.mxu3 %vm2244_vm10, %v2222_v50 }
 0x2fc   : > { %1289 = vrot.lane.b32.xlu2 %v4525_v21, %s3214_s21 }
 0x2fd   : > { %1545 = vrot.lane.b32.xlu0 %v939_v18, %s3217_s8  ;;  %v3080_v18 = vld [vmem:[%s3353_s16 + $0x30] sm:$0xff] }
 0x2fe   : > { %v4606_v9 = vpop.permute.xlu2 %1283  ;;  %1401 = vrot.lane.b32.xlu1 %v5126_v25, %s3215_s23  ;;  %v2018_v25 = vsel %vm2001_vm4, %v1985_v44, %v4192_v31  ;;  %v2091_v31 = vsel %vm339_vm0, %v2059_v28, %v4563_v57 }
 0x2ff   : > { %v1666_v12 = vpop.permute.xlu0 %1665 }
 0x300   : > { %v1522_v61 = vpop.permute.xlu1 %1521  ;;  %v2622_v6 = vpop.f32.mrf.mxu2 }
 0x301   : > { %v2623_v48 = vadd.f32 %v4309_v32, %v2622_v6  ;;  %v2382_v45 = vpop.f32.mrf.mxu1 }
 0x302   : > { %v2383_v21 = vadd.f32 %v4051_v58, %v2382_v45  ;;  %v5136_v45 = vld [vmem:[#allocation41_spill] sm:$0xff] }
 0x303   : > { %v2706_v0 = vadd.f32 %v3080_v18, %v2623_v48  ;;  %v5135_v48 = vld [vmem:[#allocation40_spill] sm:$0xff] }
 0x304   : > { %1657 = vrot.lane.b32.xlu2 %v4101_v35, %s3216_s29  ;;  %v2462_v34 = vmax.f32 %v2383_v21, 0.0  ;;  %v2051_v35 = vsel %vm2034_vm5, %v2018_v25, %v5133_v55 }
 0x305   : > { %1913 = vrot.lane.b32.xlu0 %v5132_v14, %s3219_s11  ;;  %v2738_v4 = vmax.f32 %v2706_v0, 0.0  ;;  %v2083_v29 = vsel %vm339_vm0, %v2051_v35, %v4541_v63  ;;  %v4685_v0 = vld [vmem:[#allocation2 + $0x189] sm:$0xff]  ;;  %v2060_v35 = vsel %vm2034_vm5, %v4342_v26, %v4606_v9 }
 0x306   : > { %v4623_v52 = vpop.permute.xlu2 %1651  ;;  %1417 = vrot.lane.b32.xlu1 %v4503_v41, %s3215_s23  ;;  %2966 = vmatmul.msk.f32.gmra.mxu2 %vm581_vm1, %v2462_v34  ;;  %v2116_v41 = vsel %vm2099_vm6, %v2083_v29, %v1522_v61  ;;  %v3082_v61 = vld [vmem:[#allocation2 + $0xc8] sm:$0xff]  ;;  %v4699_v34 = vld [vmem:[%s5053_s4] ss:$0 sm:$0xff] }
 0x307   : > { %v1922_v16 = vpop.permute.xlu0 %1921  ;;  %2770 = vst.msk [vmem:[%s4331_s20 + $0x30] sm:$0xff] %vm339_vm0, %v2738_v4  ;;  %v2149_v63 = vsel %vm2132_vm7, %v2116_v41, %v1650_v51  ;;  %v3081_v51 = vld [vmem:[%s3353_s16 + $0x38] sm:$0xff] }
 0x308   : > { %v1538_v39 = vpop.permute.xlu1 %1537  ;;  %v2182_v53 = vsel %vm2165_vm8, %v2149_v63, %v4583_v33  ;;  %v870_v14 = vld [vmem:[#allocation2 + $0x128] sm:$0xff] }
 0x309   : > { %v2124_v56 = vsel %vm2099_vm6, %v2091_v31, %v1538_v39  ;;  %v934_v41 = vld [vmem:[#allocation2 + $0x12a] sm:$0xff] }
 0x30a   : > { %v2157_v60 = vsel %vm2132_vm7, %v2124_v56, %v1666_v12  ;;  %v4716_v26 = vld [vmem:[#allocation2 + $0x188] sm:$0xff] }
 0x30b   : > { %v2190_v49 = vsel %vm2165_vm8, %v2157_v60, %v1794_v37 }
 0x30c   : > { %1673 = vrot.lane.b32.xlu2 %v4637_v5, %s3216_s29  ;;  %v2223_v57 = vsel %vm2198_vm9, %v2190_v49, %v1922_v16 }
 0x30d   : > { %1403 = vrot.lane.b32.xlu0 %v805_v30, %s3215_s23  ;;  %2950 = vmatmul.msk.f32.gmra.mxu3 %vm2244_vm10, %v2223_v57 }
 0x30e   : > { %v4650_v17 = vpop.permute.xlu2 %1667  ;;  %1785 = vrot.lane.b32.xlu1 %v4648_v62, %s3218_s17 }
 0x30f   : > { %v1524_v1 = vpop.permute.xlu0 %1523 }
 0x310   : > { %v1906_v15 = vpop.permute.xlu1 %1905 }
 0x311   : > { %v2215_v24 = vsel %vm2198_vm9, %v2182_v53, %v1906_v15  ;;  %v942_v53 = vld [vmem:[#allocation2 + $0x18a] sm:$0xff] }
 0x312   : > { %2942 = vmatmul.msk.f32.gmra.mxu1 %vm2244_vm10, %v2215_v24 }
 0x314   : > { %1929 = vrot.lane.b32.xlu2 %v4657_v40, %s3219_s11 }
 0x315   : > { %1419 = vrot.lane.b32.xlu0 %v908_v13, %s3215_s23  ;;  %v837_v13 = vld [vmem:[#allocation2 + $0x112] sm:$0xff] }
 0x316   : > { %v1924_v38 = vpop.permute.xlu2 %1923  ;;  %1801 = vrot.lane.b32.xlu1 %v4660_v7, %s3218_s17 }
 0x317   : > { %v1540_v20 = vpop.permute.xlu0 %1539  ;;  %v2625_v8 = vpop.f32.mrf.mxu2 }
 0x318   : > { %v1396_v33 = vpop.permute.xlu1 %1395  ;;  %v2626_v19 = vadd.f32 %v4309_v32, %v2625_v8  ;;  %v2385_v46 = vpop.f32.mrf.mxu1 }
 0x319   : > { %v2386_v54 = vadd.f32 %v4051_v58, %v2385_v46  ;;  %v5134_v58 = vld [vmem:[#allocation35_spill] sm:$0xff]  ;;  %v5138_v46 = vld [vmem:[#allocation38_spill] sm:$0xff] }
 0x31a   : > { %v2707_v37 = vadd.f32 %v3081_v51, %v2626_v19  ;;  %v1986_v6 = vsel %vm581_vm1, %v3082_v61, %v5134_v58  ;;  %v879_v19 = vld [vmem:[#allocation2 + $0x198] sm:$0xff] }
 0x31b   : > { %v2463_v42 = vmax.f32 %v2386_v54, 0.0  ;;  %v2019_v43 = vsel %vm2001_vm4, %v1986_v6, %v5135_v48  ;;  %v5139_v54 = vld [vmem:[#allocation44_spill] sm:$0xff] }
 0x31c   : > { %1531 = vrot.lane.b32.xlu2 %v837_v13, %s3217_s8  ;;  %v2739_v59 = vmax.f32 %v2707_v37, 0.0  ;;  %v2052_v18 = vsel %vm2034_vm5, %v2019_v43, %v5136_v45  ;;  %v838_v37 = vld [vmem:[#allocation2 + $0x122] sm:$0xff]  ;;  %v943_v6 = vld [vmem:[#allocation2 + $0x19a] sm:$0xff] }
 0x31d   : > { %1787 = vrot.lane.b32.xlu0 %v902_v27, %s3218_s17  ;;  %2967 = vmatmul.msk.f32.gmra.mxu2 %vm581_vm1, %v2463_v42  ;;  %v2084_v21 = vsel %vm339_vm0, %v2052_v18, %v1396_v33  ;;  %v903_v43 = vld [vmem:[#allocation2 + $0x139] sm:$0xff] }
 0x31e   : > { %v4673_v12 = vpop.permute.xlu2 %1525  ;;  %1291 = vrot.lane.b32.xlu1 %v4554_v10, %s3214_s21  ;;  %2771 = vst.msk [vmem:[%s4331_s20 + $0x38] sm:$0xff] %vm339_vm0, %v2739_v59  ;;  %v2117_v10 = vsel %vm2099_vm6, %v2084_v21, %v1524_v1 }
 0x31f   : > { %v1908_v50 = vpop.permute.xlu0 %1907  ;;  %v2150_v55 = vsel %vm2132_vm7, %v2117_v10, %v4623_v52 }
 0x320   : > { %v1412_v44 = vpop.permute.xlu1 %1411 }
 0x321   : > { %v2092_v39 = vsel %vm339_vm0, %v2060_v35, %v1412_v44 }
 0x322   : > { %v2125_v52 = vsel %vm2099_vm6, %v2092_v39, %v1540_v20  ;;  %v3084_v20 = vld [vmem:[#allocation2 + $0xd8] sm:$0xff] }
 0x323   : > { %v2158_v30 = vsel %vm2132_vm7, %v2125_v52, %v4650_v17 }
 0x324   : > { %1547 = vrot.lane.b32.xlu2 %v4574_v23, %s3217_s8 }
 0x325   : > { %1803 = vrot.lane.b32.xlu0 %v4685_v0, %s3218_s17 }
 0x326   : > { %v4693_v28 = vpop.permute.xlu2 %1541  ;;  %1659 = vrot.lane.b32.xlu1 %v870_v14, %s3216_s29  ;;  %v911_v14 = vld [vmem:[#allocation2 + $0x199] sm:$0xff] }
 0x327   : > { %v1398_v25 = vpop.permute.xlu0 %1397  ;;  %v2388_v4 = vpop.f32.mrf.mxu1 }
 0x328   : > { %v2389_v16 = vadd.f32 %v4699_v34, %v2388_v4  ;;  %v1780_v23 = vpop.permute.xlu1 %1779 }
 0x329   : > { %v2183_v31 = vsel %vm2165_vm8, %v2150_v55, %v1780_v23 }
 0x32a   : > { %v2464_v29 = vmax.f32 %v2389_v16, 0.0  ;;  %v2216_v56 = vsel %vm2198_vm9, %v2183_v31, %v1908_v50  ;;  %v935_v16 = vld [vmem:[#allocation2 + $0x13a] sm:$0xff] }
 0x32b   : > { %2943 = vmatmul.msk.f32.gmra.mxu1 %vm2244_vm10, %v2216_v56 }
 0x32c   : > { %1915 = vrot.lane.b32.xlu2 %v934_v41, %s3219_s11  ;;  %2968 = vmatmul.msk.f32.gmra.mxu2 %vm581_vm1, %v2464_v29  ;;  %v944_v29 = vld [vmem:[#allocation2 + $0x1a2] sm:$0xff] }
 0x32d   : > { %1293 = vrot.lane.b32.xlu0 %v4637_v5, %s3214_s21 }
 0x32e   : > { %v1910_v60 = vpop.permute.xlu2 %1909  ;;  %1675 = vrot.lane.b32.xlu1 %v4716_v26, %s3216_s29 }
 0x32f   : > { %v1414_v9 = vpop.permute.xlu0 %1413 }
 0x330   : > { %v1796_v49 = vpop.permute.xlu1 %1795 }
 0x331   : > { %v2191_v57 = vsel %vm2165_vm8, %v2158_v30, %v1796_v49  ;;  %v2391_v5 = vpop.f32.mrf.mxu1  ;;  %v912_v30 = vld [vmem:[#allocation2 + $0x1a1] sm:$0xff] }
 0x332   : > { %v2224_v63 = vsel %vm2198_vm9, %v2191_v57, %v1924_v38  ;;  %v2392_v1 = vadd.f32 %v4699_v34, %v2391_v5  ;;  %v5137_v38 = vld [vmem:[#allocation37_spill] sm:$0xff]  ;;  %v3085_v49 = vld [vmem:[#allocation2 + $0xe0] sm:$0xff]  ;;  %v5141_v57 = vld [vmem:[#allocation43_spill] sm:$0xff] }
 0x333   : > { %2951 = vmatmul.msk.f32.gmra.mxu3 %vm2244_vm10, %v2224_v63  ;;  %v1987_v8 = vsel %vm581_vm1, %v3084_v20, %v5137_v38  ;;  %v1988_v5 = vsel %vm581_vm1, %v3085_v49, %v5141_v57 }
 0x334   : > { %1405 = vrot.lane.b32.xlu2 %v4648_v62, %s3215_s23  ;;  %v2465_v15 = vmax.f32 %v2392_v1, 0.0  ;;  %v880_v1 = vld [vmem:[#allocation2 + $0x1a0] sm:$0xff] }
 0x335   : > { %1661 = vrot.lane.b32.xlu0 %v4346_v11, %s3216_s29  ;;  %v2020_v11 = vsel %vm2001_vm4, %v1987_v8, %v5138_v46 }
 0x336   : > { %v4730_v17 = vpop.permute.xlu2 %1399  ;;  %1931 = vrot.lane.b32.xlu1 %v942_v53, %s3219_s11  ;;  %2969 = vmatmul.msk.f32.gmra.mxu2 %vm581_vm1, %v2465_v15  ;;  %v2053_v62 = vsel %vm2034_vm5, %v2020_v11, %v5139_v54  ;;  %v5142_v15 = vld [vmem:[#allocation10_spill] sm:$0xff] }
 0x337   : > { %v1782_v24 = vpop.permute.xlu0 %1781  ;;  %v2085_v51 = vsel %vm339_vm0, %v2053_v62, %v1398_v25 }
 0x338   : > { %v1286_v33 = vpop.permute.xlu1 %1285  ;;  %v2118_v42 = vsel %vm2099_vm6, %v2085_v51, %v4673_v12 }
 0x339   : > { %v2061_v12 = vsel %vm2034_vm5, %v4374_v2, %v1286_v33  ;;  %v5144_v33 = vld [vmem:[#allocation42_spill] sm:$0xff] }
 0x33a   : > { %v2093_v10 = vsel %vm339_vm0, %v2061_v12, %v1414_v9  ;;  %v5140_v9 = vld [vmem:[#allocation11_spill] sm:$0xff] }
 0x33b   : > { %v2126_v25 = vsel %vm2099_vm6, %v2093_v10, %v4693_v28 }
 0x33c   : > { %1421 = vrot.lane.b32.xlu2 %v4660_v7, %s3215_s23 }
 0x33d   : > { %1677 = vrot.lane.b32.xlu0 %v879_v19, %s3216_s29 }
 0x33e   : > { %v4744_v13 = vpop.permute.xlu2 %1415  ;;  %1533 = vrot.lane.b32.xlu1 %v838_v37, %s3217_s8 }
 0x33f   : > { %v1798_v27 = vpop.permute.xlu0 %1797 }
 0x340   : > { %v1654_v59 = vpop.permute.xlu1 %1653  ;;  %v2394_v50 = vpop.f32.mrf.mxu1 }
 0x341   : > { %v2151_v61 = vsel %vm2132_vm7, %v2118_v42, %v1654_v59  ;;  %v2395_v58 = vadd.f32 %v4699_v34, %v2394_v50 }
 0x342   : > { %v2184_v7 = vsel %vm2165_vm8, %v2151_v61, %v1782_v24 }
 0x343   : > { %v2466_v48 = vmax.f32 %v2395_v58, 0.0  ;;  %v2217_v44 = vsel %vm2198_vm9, %v2184_v7, %v1910_v60  ;;  %v1996_v60 = vsel %vm581_vm1, %v4355_v47, %v5140_v9 }
 0x344   : > { %1789 = vrot.lane.b32.xlu2 %v903_v43, %s3218_s17  ;;  %2944 = vmatmul.msk.f32.gmra.mxu1 %vm2244_vm10, %v2217_v44 }
 0x345   : > { %1933 = vrot.lane.b32.xlu0 %v943_v6, %s3219_s11  ;;  %2970 = vmatmul.msk.f32.gmra.mxu2 %vm581_vm1, %v2466_v48 }
 0x346   : > { %v1784_v18 = vpop.permute.xlu2 %1783  ;;  %1549 = vrot.lane.b32.xlu1 %v4657_v40, %s3217_s8 }
 0x347   : > { %v1288_v45 = vpop.permute.xlu0 %1287 }
 0x348   : > { %v1670_v21 = vpop.permute.xlu1 %1669 }
 0x349   : > { %v2159_v4 = vsel %vm2132_vm7, %v2126_v25, %v1670_v21 }
 0x34a   : > { %v2192_v31 = vsel %vm2165_vm8, %v2159_v4, %v1798_v27 }
 0x34c   : > { %1805 = vrot.lane.b32.xlu2 %v911_v14, %s3218_s17  ;;  %v5145_v14 = vld [vmem:[#allocation14_spill] sm:$0xff] }
 0x34d   : > { %1551 = vrot.lane.b32.xlu0 %v942_v53, %s3217_s8  ;;  %v2029_v53 = vsel %vm2001_vm4, %v1996_v60, %v5142_v15 }
 0x34e   : > { %v1800_v55 = vpop.permute.xlu2 %1799  ;;  %1917 = vrot.lane.b32.xlu1 %v935_v16, %s3219_s11  ;;  %v2062_v20 = vsel %vm2034_vm5, %v2029_v53, %v1288_v45 }
 0x34f   : > { %v1656_v2 = vpop.permute.xlu0 %1655  ;;  %v2397_v23 = vpop.f32.mrf.mxu1  ;;  %v2094_v46 = vsel %vm339_vm0, %v2062_v20, %v4744_v13 }
 0x350   : > { %v2398_v40 = vadd.f32 %v4699_v34, %v2397_v23  ;;  %v1926_v35 = vpop.permute.xlu1 %1925 }
 0x351   : > { %v2225_v39 = vsel %vm2198_vm9, %v2192_v31, %v1926_v35 }
 0x352   : > { %v2467_v28 = vmax.f32 %v2398_v40, 0.0  ;;  %2952 = vmatmul.msk.f32.gmra.mxu3 %vm2244_vm10, %v2225_v39 }
 0x354   : > { %1423 = vrot.lane.b32.xlu2 %v4685_v0, %s3215_s23  ;;  %2971 = vmatmul.msk.f32.gmra.mxu2 %vm581_vm1, %v2467_v28  ;;  %s3161_s23 = scalar_lea.hbm %s5056_s7, 512 }
 0x355   : > { %1935 = vrot.lane.b32.xlu0 %v944_v29, %s3219_s11 }
 0x356   : > { %v1290_v41 = vpop.permute.xlu2 %1289  ;;  %1295 = vrot.lane.b32.xlu1 %v4716_v26, %s3214_s21  ;;  %v5143_v26 = vld [vmem:[#allocation39_spill] sm:$0xff] }
 0x357   : > { %v1672_v56 = vpop.permute.xlu0 %1671  ;;  %v2021_v24 = vsel %vm2001_vm4, %v1988_v5, %v5143_v26  ;;  %v3086_v5 = vld [vmem:[%s3353_s16 + $0x40] sm:$0xff] }
 0x358   : > { %v1528_v52 = vpop.permute.xlu1 %1527  ;;  %v2054_v19 = vsel %vm2034_vm5, %v2021_v24, %v5144_v33 }
 0x359   : > { %v2400_v0 = vpop.f32.mrf.mxu1  ;;  %v2086_v54 = vsel %vm339_vm0, %v2054_v19, %v4730_v17 }
 0x35a   : > { %v2401_v63 = vadd.f32 %v4699_v34, %v2400_v0  ;;  %v2119_v51 = vsel %vm2099_vm6, %v2086_v54, %v1528_v52 }
 0x35b   : > { %v2152_v59 = vsel %vm2132_vm7, %v2119_v51, %v1656_v2 }
 0x35c   : > { %1807 = vrot.lane.b32.xlu2 %v912_v30, %s3218_s17  ;;  %v2468_v47 = vmax.f32 %v2401_v63, 0.0  ;;  %v2185_v61 = vsel %vm2165_vm8, %v2152_v59, %v1784_v18  ;;  %v684_v18 = vld [vmem:[#allocation2 + $0x150] sm:$0xff] }
 0x35d   : > { %v1997_v25 = vsel %vm581_vm1, %v684_v18, %v5145_v14 }
 0x35e   : > { %1679 = vrot.lane.b32.xlu1 %v880_v1, %s3216_s29  ;;  %v1658_v8 = vpop.permute.xlu2 %1657  ;;  %2972 = vmatmul.msk.f32.gmra.mxu2 %vm581_vm1, %v2468_v47  ;;  %s2996_s29 = sshll.u32 %s3282_s28, 8  ;;  %s2797_s28 = scalar_lea.sflag [#allocation5], %s3347_s22 }
 0x35f   : > { %v1928_v38 = vpop.permute.xlu0 %1927  ;;  %s2808_s11 = scalar_lea.hbm %s5056_s7, %s2996_s29 }
 0x360   : > { %v1544_v11 = vpop.permute.xlu1 %1543  ;;  %s2811_s9 = sshll.u32 %s2808_s11, 4  ;;  %s2812_s9 = int_to_ptr.hbm [resolvable:$true] %s2811_s9 }
 0x361   : > { %v2127_v62 = vsel %vm2099_vm6, %v2094_v46, %v1544_v11  ;;  %v685_v46 = vld [vmem:[#allocation2 + $0x158] sm:$0xff]  ;;  %s3155_s10 = sshra.s32 %s2812_s9, 4  ;;  %s3156_s10 = int_to_ptr.hbm [resolvable:$true] %s3155_s10 }
 0x362   : > { %v2160_v37 = vsel %vm2132_vm7, %v2127_v62, %v1672_v56  ;;  %v5147_v62 = vld [vmem:[#allocation12_spill] sm:$0xff]  ;;  %s3157_s15 = scalar_lea.hbm %s3156_s10, 256  ;;  %p3162_p0 = scmp.lt.s32.totalorder %s3156_s10, %s5056_s7 }
 0x363   : > { %v2193_v27 = vsel %vm2165_vm8, %v2160_v37, %v1800_v55  ;;  %v5146_v55 = vld [vmem:[#allocation13_spill] sm:$0xff]  ;;  %v1998_v51 = vsel %vm581_vm1, %v685_v46, %v5147_v62  ;;  %v5148_v37 = vld [vmem:[#allocation16_spill] sm:$0xff]  ;;  %v687_v46 = vld [vmem:[#allocation2 + $0x170] sm:$0xff]  ;;  %p3158_p6 = scmp.ne.s32.totalorder %s3156_s10, %s3157_s15  ;;  %p3163_p1 = scmp.lt.s32.totalorder %s3161_s23, %s3157_s15 }
 0x364   : > { %v2226_v42 = vsel %vm2198_vm9, %v2193_v27, %v1928_v38  ;;  %v2030_v23 = vsel %vm2001_vm4, %v1997_v25, %v5146_v55 }
 0x365   : > { %2953 = vmatmul.msk.f32.gmra.mxu3 %vm2244_vm10, %v2226_v42  ;;  %v2063_v31 = vsel %vm2034_vm5, %v2030_v23, %v1290_v41  ;;  %p3159_p9 = pnand %p3158_p6, %p3311_p11  ;;  %p3164_p3 = por %p3163_p1, %p3162_p0 }
 0x366   : > { %v1674_v58 = vpop.permute.xlu2 %1673 }
 0x367   : > { %v1530_v50 = vpop.permute.xlu0 %1529  ;;  %p3160_p13 = pneg %p3159_p9 }
 0x368   : > { %v1912_v13 = vpop.permute.xlu1 %1911 }
 0x369   : > { %v2218_v17 = vsel %vm2198_vm9, %v2185_v61, %v1912_v13  ;;  %v2403_v6 = vpop.f32.mrf.mxu1  ;;  %v4850_v61 = vld [vmem:[%s5055_s6] ss:$0 sm:$0xff]  ;;  %p3165_p4 = pnand %p3164_p3, %p3160_p13 }
 0x36a   : > { %2945 = vmatmul.msk.f32.gmra.mxu1 %vm2244_vm10, %v2218_v17  ;;  %v2404_v7 = vadd.f32 %v4699_v34, %v2403_v6  ;;  %v3088_v6 = vld [vmem:[%s3353_s16 + $0x48] sm:$0xff] }
 0x36c   : > { %v2469_v48 = vmax.f32 %v2404_v7, 0.0 }
 0x36e   : > { %2973 = vmatmul.msk.f32.gmra.mxu2 %vm581_vm1, %v2469_v48  ;;  %v1930_v12 = vpop.permute.xlu2 %1929 }
 0x36f   : > { %v1546_v43 = vpop.permute.xlu0 %1545 }
 0x370   : > { %v1402_v44 = vpop.permute.xlu1 %1401 }
 0x371   : > { %v2087_v10 = vsel %vm339_vm0, %v4267_v36, %v1402_v44 }
 0x372   : > { %v2120_v4 = vsel %vm2099_vm6, %v2087_v10, %v1530_v50 }
 0x373   : > { %v2153_v40 = vsel %vm2132_vm7, %v2120_v4, %v1658_v8 }
 0x376   : > { %v1532_v16 = vpop.permute.xlu2 %1531 }
 0x377   : > { %v1914_v45 = vpop.permute.xlu0 %1913 }
 0x378   : > { %v1418_v21 = vpop.permute.xlu1 %1417 }
 0x379   : > { %v2095_v36 = vsel %vm339_vm0, %v2063_v31, %v1418_v21 }
 0x37a   : > { %v2128_v29 = vsel %vm2099_vm6, %v2095_v36, %v1546_v43 }
 0x37b   : > { %v2161_v9 = vsel %vm2132_vm7, %v2128_v29, %v1674_v58 }
 0x37e   : > { %v1548_v52 = vpop.permute.xlu2 %1547 }
 0x37f   : > { %v1404_v2 = vpop.permute.xlu0 %1403 }
 0x380   : > { %v1786_v35 = vpop.permute.xlu1 %1785  ;;  %v2088_v47 = vsel %vm339_vm0, %v4318_v3, %v1404_v2  ;;  %v2031_v3 = vsel %vm2001_vm4, %v1998_v51, %v5148_v37 }
 0x381   : > { %v2186_v39 = vsel %vm2165_vm8, %v2153_v40, %v1786_v35  ;;  %v2121_v38 = vsel %vm2099_vm6, %v2088_v47, %v1532_v16  ;;  %v686_v40 = vld [vmem:[#allocation2 + $0x168] sm:$0xff] }
 0x382   : > { %v2219_v28 = vsel %vm2198_vm9, %v2186_v39, %v1914_v45  ;;  %v5149_v35 = vld [vmem:[#allocation17_spill] sm:$0xff]  ;;  %v3089_v39 = vld [vmem:[%s3353_s16 + $0x50] sm:$0xff] }
 0x383   : > { %2946 = vmatmul.msk.f32.gmra.mxu1 %vm2244_vm10, %v2219_v28  ;;  %v1999_v31 = vsel %vm581_vm1, %v686_v40, %v5149_v35  ;;  %v5150_v28 = vld [vmem:[#allocation18_spill] sm:$0xff] }
 0x384   : > { %v2032_v29 = vsel %vm2001_vm4, %v1999_v31, %v5150_v28 }
 0x386   : > { %v1916_v24 = vpop.permute.xlu2 %1915 }
 0x387   : > { %v1420_v56 = vpop.permute.xlu0 %1419 }
 0x388   : > { %v1802_v60 = vpop.permute.xlu1 %1801 }
 0x389   : > { %v2194_v30 = vsel %vm2165_vm8, %v2161_v9, %v1802_v60  ;;  %v2628_v49 = vpop.f32.mrf.mxu2 }
 0x38a   : > { %v2227_v41 = vsel %vm2198_vm9, %v2194_v30, %v1930_v12  ;;  %v2629_v57 = vadd.f32 %v4309_v32, %v2628_v49 }
 0x38b   : > { %2954 = vmatmul.msk.f32.gmra.mxu3 %vm2244_vm10, %v2227_v41 }
 0x38c   : > { %v2708_v0 = vadd.f32 %v3086_v5, %v2629_v57 }
 0x38e   : > { %v2740_v1 = vmax.f32 %v2708_v0, 0.0  ;;  %v1406_v11 = vpop.permute.xlu2 %1405 }
 0x38f   : > { %v1788_v63 = vpop.permute.xlu0 %1787  ;;  %v2406_v15 = vpop.f32.mrf.mxu1  ;;  %v2089_v30 = vsel %vm339_vm0, %v4289_v22, %v1406_v11 }
 0x390   : > { %v2407_v53 = vadd.f32 %v4699_v34, %v2406_v15  ;;  %v1292_v26 = vpop.permute.xlu1 %1291  ;;  %2772 = vst.msk [vmem:[%s4331_s20 + $0x40] sm:$0xff] %vm339_vm0, %v2740_v1 }
 0x391   : > { %v2064_v27 = vsel %vm2034_vm5, %v2031_v3, %v1292_v26 }
 0x392   : > { %v2470_v20 = vmax.f32 %v2407_v53, 0.0  ;;  %v2096_v50 = vsel %vm339_vm0, %v2064_v27, %v1420_v56 }
 0x393   : > { %v2129_v17 = vsel %vm2099_vm6, %v2096_v50, %v1548_v52 }
 0x394   : > { %2974 = vmatmul.msk.f32.gmra.mxu2 %vm581_vm1, %v2470_v20 }
 0x396   : > { %v1422_v48 = vpop.permute.xlu2 %1421 }
 0x397   : > { %v1804_v32 = vpop.permute.xlu0 %1803 }
 0x398   : > { %v1660_v8 = vpop.permute.xlu1 %1659 }
 0x399   : > { %v2154_v33 = vsel %vm2132_vm7, %v2121_v38, %v1660_v8 }
 0x39a   : > { %v2187_v19 = vsel %vm2165_vm8, %v2154_v33, %v1788_v63  ;;  %v4889_v33 = vpop.f32.mrf.mxu3 }
 0x39b   : > { %v2220_v54 = vsel %vm2198_vm9, %v2187_v19, %v1916_v24  ;;  %v3090_v24 = vld [vmem:[%s3353_s16 + $0x58] sm:$0xff] }
 0x39c   : > { %2947 = vmatmul.msk.f32.gmra.mxu1 %vm2244_vm10, %v2220_v54  ;;  %v5151_v54 = vld [vmem:[#allocation21_spill] sm:$0xff] }
 0x39d   : > { %v2000_v62 = vsel %vm581_vm1, %v687_v46, %v5151_v54 }
 0x39e   : > { %v1790_v4 = vpop.permute.xlu2 %1789 }
 0x39f   : > { %v1294_v42 = vpop.permute.xlu0 %1293 }
 0x3a0   : > { %v1676_v59 = vpop.permute.xlu1 %1675  ;;  %v2631_v13 = vpop.f32.mrf.mxu2  ;;  %v2065_v56 = vsel %vm2034_vm5, %v2032_v29, %v1294_v42  ;;  %v5152_v42 = vld [vmem:[#allocation19_spill] sm:$0xff]  ;;  %v3093_v29 = vld [vmem:[%s3353_s16 + $0x70] sm:$0xff] }
 0x3a1   : > { %v2632_v58 = vadd.f32 %v4850_v61, %v2631_v13  ;;  %v2162_v43 = vsel %vm2132_vm7, %v2129_v17, %v1676_v59  ;;  %v2097_v9 = vsel %vm339_vm0, %v2065_v56, %v1422_v48  ;;  %v2033_v59 = vsel %vm2001_vm4, %v2000_v62, %v5152_v42  ;;  %v3091_v17 = vld [vmem:[%s3353_s16 + $0x60] sm:$0xff] }
 0x3a2   : > { %v2195_v10 = vsel %vm2165_vm8, %v2162_v43, %v1804_v32 }
 0x3a3   : > { %v2709_v7 = vadd.f32 %v3088_v6, %v2632_v58  ;;  %v4899_v58 = vpop.f32.mrf.mxu3 }
 0x3a5   : > { %v2741_v44 = vmax.f32 %v2709_v7, 0.0 }
 0x3a6   : > { %v1806_v41 = vpop.permute.xlu2 %1805 }
 0x3a7   : > { %v1662_v12 = vpop.permute.xlu0 %1661  ;;  %2773 = vst.msk [vmem:[%s4331_s20 + $0x48] sm:$0xff] %vm339_vm0, %v2741_v44 }
 0x3a8   : > { %v1932_v45 = vpop.permute.xlu1 %1931  ;;  %v2409_v21 = vpop.f32.mrf.mxu1 }
 0x3a9   : > { %v2410_v18 = vadd.f32 %v4699_v34, %v2409_v21  ;;  %v2228_v14 = vsel %vm2198_vm9, %v2195_v10, %v1932_v45 }
 0x3aa   : > { %2955 = vmatmul.msk.f32.gmra.mxu3 %vm2244_vm10, %v2228_v14 }
 0x3ab   : > { %v2471_v25 = vmax.f32 %v2410_v18, 0.0 }
 0x3ad   : > { %2975 = vmatmul.msk.f32.gmra.mxu2 %vm581_vm1, %v2471_v25 }
 0x3ae   : > { %v1424_v51 = vpop.permute.xlu2 %1423 }
 0x3af   : > { %v2634_v16 = vpop.f32.mrf.mxu2  ;;  %v1678_v55 = vpop.permute.xlu0 %1677 }
 0x3b0   : > { %v1534_v2 = vpop.permute.xlu1 %1533  ;;  %v2635_v23 = vadd.f32 %v4850_v61, %v2634_v16 }
 0x3b1   : > { %v2122_v57 = vsel %vm2099_vm6, %v2089_v30, %v1534_v2 }
 0x3b2   : > { %v2710_v36 = vadd.f32 %v3089_v39, %v2635_v23  ;;  %v2155_v26 = vsel %vm2132_vm7, %v2122_v57, %v1662_v12 }
 0x3b3   : > { %v2188_v32 = vsel %vm2165_vm8, %v2155_v26, %v1790_v4 }
 0x3b4   : > { %v2742_v52 = vmax.f32 %v2710_v36, 0.0 }
 0x3b6   : > { %2774 = vst.msk [vmem:[%s4331_s20 + $0x50] sm:$0xff] %vm339_vm0, %v2742_v52  ;;  %v1808_v43 = vpop.permute.xlu2 %1807  ;;  %v2433_v18 = vpop.f32.mrf.mxu3 }
 0x3b7   : > { %v1934_v63 = vpop.permute.xlu0 %1933  ;;  %v2434_v25 = vadd.f32 %v4699_v34, %v2433_v18  ;;  %v3097_v18 = vld [vmem:[%s3353_s16 + $0x90] sm:$0xff] }
 0x3b8   : > { %v1550_v60 = vpop.permute.xlu1 %1549 }
 0x3b9   : > { %v2130_v49 = vsel %vm2099_vm6, %v2097_v9, %v1550_v60  ;;  %v2637_v0 = vpop.f32.mrf.mxu2  ;;  %v2479_v2 = vmax.f32 %v2434_v25, 0.0  ;;  %v2431_v25 = vadd.f32 %v4699_v34, %v4899_v58 }
 0x3ba   : > { %v2163_v5 = vsel %vm2132_vm7, %v2130_v49, %v1678_v55  ;;  %v2638_v1 = vadd.f32 %v4850_v61, %v2637_v0  ;;  %v3092_v55 = vld [vmem:[%s3353_s16 + $0x68] sm:$0xff] }
 0x3bb   : > { %v2196_v15 = vsel %vm2165_vm8, %v2163_v5, %v1806_v41 }
 0x3bc   : > { %v2229_v53 = vsel %vm2198_vm9, %v2196_v15, %v1934_v63  ;;  %v2711_v22 = vadd.f32 %v3090_v24, %v2638_v1  ;;  %v3094_v63 = vld [vmem:[%s3353_s16 + $0x78] sm:$0xff] }
 0x3bd   : > { %2956 = vmatmul.msk.f32.gmra.mxu3 %vm2244_vm10, %v2229_v53 }
 0x3be   : > { %v2743_v20 = vmax.f32 %v2711_v22, 0.0 }
 0x3bf   : > { %v1552_v37 = vpop.permute.xlu0 %1551 }
 0x3c0   : > { %v1918_v47 = vpop.permute.xlu1 %1917  ;;  %2775 = vst.msk [vmem:[%s4331_s20 + $0x58] sm:$0xff] %vm339_vm0, %v2743_v20 }
 0x3c1   : > { %v2221_v38 = vsel %vm2198_vm9, %v2188_v32, %v1918_v47  ;;  %v2412_v8 = vpop.f32.mrf.mxu1 }
 0x3c2   : > { %2948 = vmatmul.msk.f32.gmra.mxu1 %vm2244_vm10, %v2221_v38  ;;  %v2413_v19 = vadd.f32 %v4699_v34, %v2412_v8 }
 0x3c4   : > { %v2472_v11 = vmax.f32 %v2413_v19, 0.0  ;;  %v3095_v19 = vld [vmem:[%s3353_s16 + $0x80] sm:$0xff] }
 0x3c6   : > { %2976 = vmatmul.msk.f32.gmra.mxu2 %vm581_vm1, %v2472_v11 }
 0x3c7   : > { %v1936_v45 = vpop.permute.xlu0 %1935 }
 0x3c8   : > { %v1296_v3 = vpop.permute.xlu1 %1295  ;;  %v2640_v27 = vpop.f32.mrf.mxu2 }
 0x3c9   : > { %v2641_v50 = vadd.f32 %v4850_v61, %v2640_v27  ;;  %v2066_v13 = vsel %vm2034_vm5, %v2033_v59, %v1296_v3  ;;  %v3096_v59 = vld [vmem:[%s3353_s16 + $0x88] sm:$0xff] }
 0x3ca   : > { %v2098_v7 = vsel %vm339_vm0, %v2066_v13, %v1424_v51 }
 0x3cb   : > { %v2712_v6 = vadd.f32 %v3091_v17, %v2641_v50  ;;  %v2131_v44 = vsel %vm2099_vm6, %v2098_v7, %v1552_v37 }
 0x3cd   : > { %v2744_v48 = vmax.f32 %v2712_v6, 0.0 }
 0x3cf   : > { %2776 = vst.msk [vmem:[%s4331_s20 + $0x60] sm:$0xff] %vm339_vm0, %v2744_v48 }
 0x3d0   : > { %v1680_v12 = vpop.permute.xlu1 %1679 }
 0x3d1   : > { %v2164_v21 = vsel %vm2132_vm7, %v2131_v44, %v1680_v12  ;;  %v2428_v12 = vadd.f32 %v4699_v34, %v4889_v33 }
 0x3d2   : > { %v2197_v10 = vsel %vm2165_vm8, %v2164_v21, %v1808_v43 }
 0x3d3   : > { %v2230_v14 = vsel %vm2198_vm9, %v2197_v10, %v1936_v45  ;;  %v2477_v45 = vmax.f32 %v2428_v12, 0.0 }
 0x3d4   : > { %2957 = vmatmul.msk.f32.gmra.mxu3 %vm2244_vm10, %v2230_v14 }
 0x3d5   : > { %v2436_v40 = vpop.f32.mrf.mxu3 }
 0x3d6   : > { %v2437_v31 = vadd.f32 %v4699_v34, %v2436_v40 }
 0x3d7   : > { %v2643_v4 = vpop.f32.mrf.mxu2 }
 0x3d8   : > { %v2644_v16 = vadd.f32 %v4850_v61, %v2643_v4  ;;  %v2480_v39 = vmax.f32 %v2437_v31, 0.0 }
 0x3da   : > { %v2713_v23 = vadd.f32 %v3092_v55, %v2644_v16  ;;  %v2478_v16 = vmax.f32 %v2431_v25, 0.0  ;;  %v3109_v25 = vld [vmem:[%s3353_s16 + $0xc0] sm:$0xff] }
 0x3dc   : > { %v2745_v35 = vmax.f32 %v2713_v23, 0.0  ;;  %2983 = vmatmul.msk.f32.vlgmr.msra.gmra.mxu3 %vm581_vm1, %v2479_v2 }
 0x3de   : > { %2777 = vst.msk [vmem:[%s4331_s20 + $0x68] sm:$0xff] %vm339_vm0, %v2745_v35  ;;  %v3098_v35 = vld [vmem:[%s3353_s16 + $0xc8] sm:$0xff] }
 0x3e1   : > { %v2646_v36 = vpop.f32.mrf.mxu2 }
 0x3e2   : > { %v2647_v28 = vadd.f32 %v4850_v61, %v2646_v36 }
 0x3e4   : > { %2984 = vmatmul.msk.f32.gmra.mxu3 %vm581_vm1, %v2480_v39  ;;  %v2714_v56 = vadd.f32 %v3093_v29, %v2647_v28  ;;  %v3099_v28 = vld [vmem:[%s3353_s16 + $0xd0] sm:$0xff] }
 0x3e6   : > { %v2746_v52 = vmax.f32 %v2714_v56, 0.0 }
 0x3e7   : > { %v2415_v9 = vpop.f32.mrf.mxu1 }
 0x3e8   : > { %v2416_v60 = vadd.f32 %v4699_v34, %v2415_v9  ;;  %v2439_v30 = vpop.f32.mrf.mxu3  ;;  %2778 = vst.msk [vmem:[%s4331_s20 + $0x70] sm:$0xff] %vm339_vm0, %v2746_v52 }
 0x3e9   : > { %v2440_v49 = vadd.f32 %v4699_v34, %v2439_v30  ;;  %v3100_v30 = vld [vmem:[%s3353_s16 + $0x98] sm:$0xff] }
 0x3ea   : > { %v2473_v41 = vmax.f32 %v2416_v60, 0.0 }
 0x3eb   : > { %v2481_v57 = vmax.f32 %v2440_v49, 0.0 }
 0x3ec   : > { %2977 = vmatmul.msk.f32.gmra.mxu2 %vm581_vm1, %v2473_v41  ;;  %v3101_v41 = vld [vmem:[%s3353_s16 + $0xd8] sm:$0xff] }
 0x3ed   : > { %2985 = vmatmul.msk.f32.gmra.mxu3 %vm581_vm1, %v2481_v57 }
 0x3f1   : > { %v2649_v5 = vpop.f32.mrf.mxu2 }
 0x3f2   : > { %v2650_v0 = vadd.f32 %v4850_v61, %v2649_v5 }
 0x3f4   : > { %v2715_v1 = vadd.f32 %v3094_v63, %v2650_v0 }
 0x3f6   : > { %v2747_v15 = vmax.f32 %v2715_v1, 0.0 }
 0x3f8   : > { %2779 = vst.msk [vmem:[%s4331_s20 + $0x78] sm:$0xff] %vm339_vm0, %v2747_v15  ;;  %v3102_v15 = vld [vmem:[%s3353_s16 + $0xa0] sm:$0xff] }
 0x400   : > { %v2418_v53 = vpop.f32.mrf.mxu1 }
 0x401   : > { %v2419_v26 = vadd.f32 %v4699_v34, %v2418_v53 }
 0x403   : > { %v2474_v24 = vmax.f32 %v2419_v26, 0.0 }
 0x405   : > { %2978 = vmatmul.msk.f32.gmra.mxu2 %vm581_vm1, %v2474_v24 }
 0x40e   : > { %v2442_v22 = vpop.f32.mrf.mxu3 }
 0x40f   : > { %v2443_v20 = vadd.f32 %v4699_v34, %v2442_v22 }
 0x411   : > { %v2482_v47 = vmax.f32 %v2443_v20, 0.0  ;;  %v3103_v20 = vld [vmem:[%s3353_s16 + $0xe0] sm:$0xff] }
 0x413   : > { %2986 = vmatmul.msk.f32.gmra.mxu3 %vm581_vm1, %v2482_v47 }
 0x417   : > { %v2652_v32 = vpop.f32.mrf.mxu2 }
 0x418   : > { %v2653_v38 = vadd.f32 %v4850_v61, %v2652_v32 }
 0x419   : > { %v2421_v8 = vpop.f32.mrf.mxu1 }
 0x41a   : > { %v2716_v46 = vadd.f32 %v3095_v19, %v2653_v38  ;;  %v2422_v11 = vadd.f32 %v4699_v34, %v2421_v8  ;;  %v3104_v19 = vld [vmem:[%s3353_s16 + $0xa8] sm:$0xff] }
 0x41c   : > { %v2748_v54 = vmax.f32 %v2716_v46, 0.0  ;;  %v2475_v62 = vmax.f32 %v2422_v11, 0.0 }
 0x41e   : > { %2780 = vst.msk [vmem:[%s4331_s20 + $0x80] sm:$0xff] %vm339_vm0, %v2748_v54  ;;  %2979 = vmatmul.msk.f32.gmra.mxu2 %vm581_vm1, %v2475_v62 }
 0x42d   : > { %v2445_v51 = vpop.f32.mrf.mxu3 }
 0x42e   : > { %v2446_v37 = vadd.f32 %v4699_v34, %v2445_v51  ;;  %v3105_v51 = vld [vmem:[%s3353_s16 + $0xe8] sm:$0xff] }
 0x430   : > { %v2483_v3 = vmax.f32 %v2446_v37, 0.0  ;;  %v2655_v27 = vpop.f32.mrf.mxu2 }
 0x431   : > { %v2656_v42 = vadd.f32 %v4850_v61, %v2655_v27 }
 0x432   : > { %2987 = vmatmul.msk.f32.gmra.mxu3 %vm581_vm1, %v2483_v3 }
 0x433   : > { %v2717_v50 = vadd.f32 %v3096_v59, %v2656_v42 }
 0x435   : > { %v2749_v13 = vmax.f32 %v2717_v50, 0.0 }
 0x437   : > { %2781 = vst.msk [vmem:[%s4331_s20 + $0x88] sm:$0xff] %vm339_vm0, %v2749_v13  ;;  %v3106_v13 = vld [vmem:[%s3353_s16 + $0xb0] sm:$0xff] }
 0x43f   : > { %v2424_v17 = vpop.f32.mrf.mxu1 }
 0x440   : > { %v2425_v6 = vadd.f32 %v4699_v34, %v2424_v17  ;;  %v2448_v7 = vpop.f32.mrf.mxu3 }
 0x441   : > { %v2449_v48 = vadd.f32 %v4699_v34, %v2448_v7 }
 0x442   : > { %v2476_v43 = vmax.f32 %v2425_v6, 0.0  ;;  %v3107_v6 = vld [vmem:[%s3353_s16 + $0xf0] sm:$0xff] }
 0x443   : > { %v2484_v44 = vmax.f32 %v2449_v48, 0.0 }
 0x444   : > { %2980 = vmatmul.msk.f32.gmra.mxu2 %vm581_vm1, %v2476_v43 }
 0x445   : > { %2988 = vmatmul.msk.f32.gmra.mxu3 %vm581_vm1, %v2484_v44 }
 0x449   : > { %v2658_v21 = vpop.f32.mrf.mxu2 }
 0x44a   : > { %v2659_v10 = vadd.f32 %v4850_v61, %v2658_v21 }
 0x44c   : > { %2981 = vmatmul.msk.f32.gmra.mxu2 %vm581_vm1, %v2477_v45  ;;  %v2718_v14 = vadd.f32 %v3097_v18, %v2659_v10  ;;  %v3108_v45 = vld [vmem:[%s3353_s16 + $0xb8] sm:$0xff] }
 0x44e   : > { %v2750_v4 = vmax.f32 %v2718_v14, 0.0 }
 0x450   : > { %2782 = vst.msk [vmem:[%s4331_s20 + $0x90] sm:$0xff] %vm339_vm0, %v2750_v4 }
 0x454   : > { %2982 = vmatmul.msk.f32.gmra.mxu2 %vm581_vm1, %v2478_v16 }
 0x457   : > { %v2451_v33 = vpop.f32.mrf.mxu3 }
 0x458   : > { %v2452_v2 = vadd.f32 %v4699_v34, %v2451_v33 }
 0x45a   : > { %v2485_v55 = vmax.f32 %v2452_v2, 0.0 }
 0x45c   : > { %2989 = vmatmul.msk.f32.gmra.mxu3 %vm581_vm1, %v2485_v55  ;;  %v3110_v55 = vld [vmem:[%s3353_s16 + $0xf8] sm:$0xff] }
 0x45f   : > { %v2679_v23 = vpop.f32.mrf.mxu3 }
 0x460   : > { %v2680_v40 = vadd.f32 %v4850_v61, %v2679_v23 }
 0x462   : > { %v2725_v58 = vadd.f32 %v3098_v35, %v2680_v40 }
 0x464   : > { %v2757_v31 = vmax.f32 %v2725_v58, 0.0 }
 0x466   : > { %2789 = vst.msk [vmem:[%s4331_s20 + $0xc8] sm:$0xff] %vm339_vm0, %v2757_v31 }
 0x467   : > { %v2682_v39 = vpop.f32.mrf.mxu3 }
 0x468   : > { %v2683_v36 = vadd.f32 %v4850_v61, %v2682_v39 }
 0x46a   : > { %v2726_v34 = vadd.f32 %v3099_v28, %v2683_v36 }
 0x46c   : > { %v2758_v29 = vmax.f32 %v2726_v34, 0.0 }
 0x46e   : > { %2790 = vst.msk [vmem:[%s4331_s20 + $0xd0] sm:$0xff] %vm339_vm0, %v2758_v29 }
 0x46f   : > { %v2661_v56 = vpop.f32.mrf.mxu2 }
 0x470   : > { %v2662_v52 = vadd.f32 %v4850_v61, %v2661_v56  ;;  %v2685_v9 = vpop.f32.mrf.mxu3 }
 0x471   : > { %v2686_v60 = vadd.f32 %v4850_v61, %v2685_v9 }
 0x472   : > { %v2719_v49 = vadd.f32 %v3100_v30, %v2662_v52 }
 0x473   : > { %v2727_v57 = vadd.f32 %v3101_v41, %v2686_v60 }
 0x474   : > { %v2751_v5 = vmax.f32 %v2719_v49, 0.0 }
 0x475   : > { %v2759_v0 = vmax.f32 %v2727_v57, 0.0 }
 0x476   : > { %2783 = vst.msk [vmem:[%s4331_s20 + $0x98] sm:$0xff] %vm339_vm0, %v2751_v5 }
 0x477   : > { %2791 = vst.msk [vmem:[%s4331_s20 + $0xd8] sm:$0xff] %vm339_vm0, %v2759_v0 }
 0x488   : > { %v2664_v63 = vpop.f32.mrf.mxu2 }
 0x489   : > { %v2665_v1 = vadd.f32 %v4850_v61, %v2664_v63 }
 0x48b   : > { %v2720_v53 = vadd.f32 %v3102_v15, %v2665_v1 }
 0x48d   : > { %v2752_v26 = vmax.f32 %v2720_v53, 0.0 }
 0x48f   : > { %2784 = vst.msk [vmem:[%s4331_s20 + $0xa0] sm:$0xff] %vm339_vm0, %v2752_v26 }
 0x496   : > { %v2688_v24 = vpop.f32.mrf.mxu3 }
 0x497   : > { %v2689_v22 = vadd.f32 %v4850_v61, %v2688_v24 }
 0x499   : > { %v2728_v47 = vadd.f32 %v3103_v20, %v2689_v22 }
 0x49b   : > { %v2760_v32 = vmax.f32 %v2728_v47, 0.0 }
 0x49d   : > { %2792 = vst.msk [vmem:[%s4331_s20 + $0xe0] sm:$0xff] %vm339_vm0, %v2760_v32 }
 0x4a1   : > { %v2667_v38 = vpop.f32.mrf.mxu2 }
 0x4a2   : > { %v2668_v8 = vadd.f32 %v4850_v61, %v2667_v38 }
 0x4a4   : > { %v2721_v46 = vadd.f32 %v3104_v19, %v2668_v8 }
 0x4a6   : > { %v2753_v11 = vmax.f32 %v2721_v46, 0.0 }
 0x4a8   : > { %2785 = vst.msk [vmem:[%s4331_s20 + $0xa8] sm:$0xff] %vm339_vm0, %v2753_v11 }
 0x4b5   : > { %v2691_v54 = vpop.f32.mrf.mxu3 }
 0x4b6   : > { %v2692_v62 = vadd.f32 %v4850_v61, %v2691_v54 }
 0x4b8   : > { %v2729_v37 = vadd.f32 %v3105_v51, %v2692_v62 }
 0x4ba   : > { %v2761_v3 = vmax.f32 %v2729_v37, 0.0 }
 0x4bc   : > { %2793 = vst.msk [vmem:[%s4331_s20 + $0xe8] sm:$0xff] %vm339_vm0, %v2761_v3 }
 0x4c7   : > { %v2670_v27 = vpop.f32.mrf.mxu2 }
 0x4c8   : > { %v2671_v42 = vadd.f32 %v4850_v61, %v2670_v27  ;;  %v2694_v59 = vpop.f32.mrf.mxu3 }
 0x4c9   : > { %v2695_v50 = vadd.f32 %v4850_v61, %v2694_v59 }
 0x4ca   : > { %v2722_v17 = vadd.f32 %v3106_v13, %v2671_v42 }
 0x4cb   : > { %v2730_v7 = vadd.f32 %v3107_v6, %v2695_v50 }
 0x4cc   : > { %v2754_v48 = vmax.f32 %v2722_v17, 0.0 }
 0x4cd   : > { %v2762_v43 = vmax.f32 %v2730_v7, 0.0 }
 0x4ce   : > { %2786 = vst.msk [vmem:[%s4331_s20 + $0xb0] sm:$0xff] %vm339_vm0, %v2754_v48 }
 0x4cf   : > { %2794 = vst.msk [vmem:[%s4331_s20 + $0xf0] sm:$0xff] %vm339_vm0, %v2762_v43  ;;  %v2673_v44 = vpop.f32.mrf.mxu2 }
 0x4d0   : > { %v2674_v12 = vadd.f32 %v4850_v61, %v2673_v44 }
 0x4d2   : > { %v2723_v21 = vadd.f32 %v3108_v45, %v2674_v12 }
 0x4d4   : > { %v2755_v10 = vmax.f32 %v2723_v21, 0.0 }
 0x4d6   : > { %2787 = vst.msk [vmem:[%s4331_s20 + $0xb8] sm:$0xff] %vm339_vm0, %v2755_v10 }
 0x4d7   : > { %v2676_v18 = vpop.f32.mrf.mxu2 }
 0x4d8   : > { %v2677_v14 = vadd.f32 %v4850_v61, %v2676_v18 }
 0x4da   : > { %v2724_v4 = vadd.f32 %v3109_v25, %v2677_v14 }
 0x4dc   : > { %v2756_v16 = vmax.f32 %v2724_v4, 0.0 }
 0x4de   : > { %2788 = vst.msk [vmem:[%s4331_s20 + $0xc0] sm:$0xff] %vm339_vm0, %v2756_v16 }
 0x4df   : > { %v2697_v33 = vpop.f32.mrf.mxu3 }
 0x4e0   : > { %v2698_v2 = vadd.f32 %v4850_v61, %v2697_v33 }
 0x4e2   : > { %v2731_v23 = vadd.f32 %v3110_v55, %v2698_v2 }
 0x4e4   : > { %v2763_v40 = vmax.f32 %v2731_v23, 0.0 }
 0x4e6   : > { %2795 = vst.msk [vmem:[%s4331_s20 + $0xf8] sm:$0xff] %vm339_vm0, %v2763_v40 }
 0x4e7   : > { %3168 = shalt.err (!%p3165_p4)
}
 0x4e8   : > { %s3220_s22 = smov 128  }
 0x4e9   : > { %3013 = dma.vmem_to_hbm [thread:$0]  (%p3311_p11), %s2810_s18, 4096, %s2812_s9, %s2797_s28, %s3220_s22, %s3220_s22, %s3212_s19  }
 0x4ea PF: > { %s2826_s20 = sand.u32 1, %s3195_s24   ;;  %p5153_p7 = scmp.ge.s32.totalorder %s3207_s27, 2 }
 0x4eb   : > { %s2827_s8 = scalar_lea.sflag [#allocation5], %s2826_s20 }
 0x4ec   : > { %p3020_p5 = pnand %p5153_p7, %p3315_p12 }
 0x4ee   : > { %p3021_p8 = pneg %p3020_p5 }
 0x4f0   : > { %3190 = dma.done.wait (%p3021_p8), %s2827_s8, 4096  }
 0x4f1   : > { %3192 = vsyncadd (%p3021_p8), %s2827_s8, 4294963200  ;;  %s5154_s17 = sld [smem:[#allocation9_spill]]  ;;  %p20_p10 = scmp.ge.s32.totalorder %s3286_s30, 4  }
 0x4f2   : > { %s5155_s24 = smov %s3199_s25  ;;  %s5156_s25 = smov %s3203_s26 }
 0x4f3   : > { %s5158_s27 = smov %s3286_s30  ;;  %22 = sbr.rel (!%p20_p10) target bundleno = 5 (0x5), region = 96 }
 0x4f7   : > { %s5157_s26 = smov %s5154_s17 }
 0x4f8   :  { %2833 = vsyncpa [#allocation4], 1 }
 0x4f9   :  { %2835 = vsyncpa [#allocation4 + $0x1], 1 }
 0x4fa   :  { %2836 = vsyncpa [#allocation5], 1 }
 0x4fb   :  { %2838 = vsyncpa [#allocation5 + $0x1], 1 }

</bundles_post_ra>
